<compile_context>
chip_gen: v7x
topology: tpu7x:2x2x1
jax: 0.10.0
libtpu: 0.0.40
codegen_flags: <defaults>
</compile_context>

<pallas_src>
import functools

import jax
import jax.numpy as jnp
from jax.experimental import pallas as pl
from jax.experimental.pallas import tpu as pltpu


# --------------------------------------------------------------------------
# Kernels
# --------------------------------------------------------------------------
def _se_pool_fc_kernel(x_ref, w1_ref, w2_ref, s_ref, *, inv_l):
    """Pass 1: accumulate sum over L, then FC1+ReLU+FC2+sigmoid at last step.

    x_ref : (TB, C, TL)   input tile
    w1_ref: (C, H)        fc1 weight (already transposed)
    w2_ref: (H, C)        fc2 weight (already transposed)
    s_ref : (TB, C) f32   output scale; resident across the L grid axis.
    """
    l = pl.program_id(1)

    @pl.when(l == 0)
    def _init():
        s_ref[...] = jnp.zeros_like(s_ref)

    # f32 accumulation of the pool without materializing an f32 copy of x.
    s_ref[...] += jnp.sum(x_ref[...], axis=-1, dtype=jnp.float32)

    @pl.when(l == pl.num_programs(1) - 1)
    def _finalize():
        y = s_ref[...] * jnp.float32(inv_l)                               # mean (B, C)
        h = jnp.dot(y, w1_ref[...], preferred_element_type=jnp.float32)   # (B, H)
        h = jnp.maximum(h, 0.0)                                           # ReLU
        s = jnp.dot(h, w2_ref[...], preferred_element_type=jnp.float32)   # (B, C)
        s_ref[...] = jax.nn.sigmoid(s)


def _se_scale_kernel(x_ref, s_ref, o_ref):
    """Pass 2: out = x * scale, broadcast over L, in the native dtype."""
    s = s_ref[...].astype(x_ref.dtype)           # (TB, C)
    o_ref[...] = x_ref[...] * s[:, :, None]      # broadcast over lanes (L)


# --------------------------------------------------------------------------
# Tiling helpers
# --------------------------------------------------------------------------
def _largest_divisor_leq(n, cap):
    cap = max(1, min(n, cap))
    for d in range(cap, 0, -1):
        if n % d == 0:
            return d
    return 1


def _pick_tiles(B, C, L, itemsize, max_block_bytes):
    # Batch tile: (TB, C) scale blocks need TB % 8 == 0 or TB == B.
    TB = 8 if (B % 8 == 0) else B
    TB = min(TB, B)
    # Length tile: must be a multiple of 128 (lane-dense) or the full L.
    cap_elems = max(128, max_block_bytes // (itemsize * TB * C))
    if L % 128 == 0:
        TL = 128 * _largest_divisor_leq(L // 128, max(1, cap_elems // 128))
    else:
        TL = L  # full-extent last dim (small / odd L)
    return TB, TL


# --------------------------------------------------------------------------
# Wrapper
# --------------------------------------------------------------------------
def se_layer(x, w_fc1, w_fc2, *, max_block_bytes=2 * 1024 * 1024):
    """SE layer forward.

    x:     (B, C, L)
    w_fc1: (H, C)   PyTorch Linear weight layout (out_features, in_features)
    w_fc2: (C, H)   PyTorch Linear weight layout
    """
    B, C, L = x.shape
    H = w_fc1.shape[0]

    # y @ W.T in PyTorch == y @ W_transposed; tiny one-time XLA transposes.
    w1_t = jnp.transpose(w_fc1)  # (C, H)
    w2_t = jnp.transpose(w_fc2)  # (H, C)

    itemsize = jnp.dtype(x.dtype).itemsize
    TB, TL = _pick_tiles(B, C, L, itemsize, max_block_bytes)
    grid = (B // TB, L // TL)

    # ---- Pass 1: pool over L + tiny FC stack -> per-(b, c) scale ----------
    scale = pl.pallas_call(
        functools.partial(_se_pool_fc_kernel, inv_l=1.0 / L),
        out_shape=jax.ShapeDtypeStruct((B, C), jnp.float32),
        grid_spec=pltpu.PrefetchScalarGridSpec(
            num_scalar_prefetch=0,
            grid=grid,
            in_specs=[
                pl.BlockSpec((TB, C, TL), lambda b, l: (b, 0, l)),
                pl.BlockSpec((C, H), lambda b, l: (0, 0)),
                pl.BlockSpec((H, C), lambda b, l: (0, 0)),
            ],
            out_specs=pl.BlockSpec((TB, C), lambda b, l: (b, 0)),
        ),
        compiler_params=pltpu.CompilerParams(
            dimension_semantics=("parallel", "arbitrary"),
            vmem_limit_bytes=32 * 1024 * 1024,
        ),
    )(x, w1_t, w2_t)

    # ---- Pass 2: stream x again and apply the channel scale ---------------
    out = pl.pallas_call(
        _se_scale_kernel,
        out_shape=jax.ShapeDtypeStruct((B, C, L), x.dtype),
        grid_spec=pltpu.PrefetchScalarGridSpec(
            num_scalar_prefetch=0,
            grid=grid,
            in_specs=[
                pl.BlockSpec((TB, C, TL), lambda b, l: (b, 0, l)),
                pl.BlockSpec((TB, C), lambda b, l: (b, 0)),
            ],
            out_specs=pl.BlockSpec((TB, C, TL), lambda b, l: (b, 0, l)),
        ),
        compiler_params=pltpu.CompilerParams(
            dimension_semantics=("parallel", "parallel"),
            vmem_limit_bytes=32 * 1024 * 1024,
        ),
    )(x, scale)

    return out


def se_layer_ref(x, w_fc1, w_fc2):
    """Pure-JAX reference mirroring the PyTorch forward."""
    y = jnp.mean(x, axis=-1)                 # avg_pool -> (B, C)
    h = jnp.maximum(y @ w_fc1.T, 0.0)        # Linear + ReLU
    s = jax.nn.sigmoid(h @ w_fc2.T)          # Linear + Sigmoid
    return x * s[:, :, None]


if __name__ == "__main__":
    # Small shapes consistent with the module: channel=128, reduction=16 -> H=8.
    # L=2048 keeps things small (~4 MiB) while exercising multi-tile
    # accumulation over the L grid axis (lane-dense 128-multiple tiles).
    B, C, L = 4, 128, 2048
    reduction = 16
    H = C // reduction

    key = jax.random.PRNGKey(0)
    kx, k1, k2 = jax.random.split(key, 3)

    x = jax.random.normal(kx, (B, C, L), dtype=jnp.float32)
    # Deterministic synthetic weights (PyTorch Linear layout: (out, in)).
    w_fc1 = jax.random.normal(k1, (H, C), dtype=jnp.float32) * 0.1
    w_fc2 = jax.random.normal(k2, (C, H), dtype=jnp.float32) * 0.1

    out = jax.block_until_ready(se_layer(x, w_fc1, w_fc2))

    ref = se_layer_ref(x, w_fc1, w_fc2)
    assert out.shape == (B, C, L)
    assert jnp.allclose(out, ref, atol=1e-5, rtol=1e-5), "mismatch vs reference"

    print("KERNEL_OK")
</pallas_src>

<mosaic_0001>
module attributes {stable_mosaic.version = 11 : i64} {
  func.func @_se_pool_fc_kernel(%arg0: i32, %arg1: i32, %arg2: memref<4x128x1024xf32, #tpu.memory_space<vmem>>, %arg3: memref<128x8xf32, #tpu.memory_space<vmem>>, %arg4: memref<8x128xf32, #tpu.memory_space<vmem>>, %arg5: memref<4x128xf32, #tpu.memory_space<vmem>>) attributes {dimension_semantics = [#tpu.dimension_semantics<parallel>, #tpu.dimension_semantics<arbitrary>], iteration_bounds = array<i64: 1, 2>, scalar_prefetch = 0 : i64, scratch_operands = 0 : i64, tpu.core_type = #tpu.core_type<tc>, window_params = [{transform_indices = @transform_0, window_bounds = array<i64: 4, 128, 1024>}, {pipeline_mode = #tpu.pipeline_mode<synchronous>, transform_indices = @transform_1, window_bounds = array<i64: 128, 8>}, {pipeline_mode = #tpu.pipeline_mode<synchronous>, transform_indices = @transform_2, window_bounds = array<i64: 8, 128>}, {transform_indices = @transform_3, window_bounds = array<i64: 4, 128>}]} {
    %c0_i32 = arith.constant 0 : i32
    %0 = arith.cmpi eq, %arg1, %c0_i32 : i32
    %1 = arith.extui %0 : i1 to i32
    %c0_i32_0 = arith.constant 0 : i32
    %2 = arith.cmpi ne, %1, %c0_i32_0 : i32
    scf.if %2 {
      %cst_8 = arith.constant 0.000000e+00 : f32
      %11 = vector.broadcast %cst_8 : f32 to vector<4x128xf32>
      %c0_9 = arith.constant 0 : index
      %c0_10 = arith.constant 0 : index
      %12 = vector.load %arg5[%c0_9, %c0_10] : memref<4x128xf32, #tpu.memory_space<vmem>>, vector<4x128xf32>
      tpu.vector_store %arg5[%c0_9, %c0_10], %11 {strides = array<i32>} : memref<4x128xf32, #tpu.memory_space<vmem>>, vector<4x128xf32>,
    } else {
    }
    %c0 = arith.constant 0 : index
    %c0_1 = arith.constant 0 : index
    %3 = vector.load %arg5[%c0, %c0_1] : memref<4x128xf32, #tpu.memory_space<vmem>>, vector<4x128xf32>
    %c0_2 = arith.constant 0 : index
    %c0_3 = arith.constant 0 : index
    %c0_4 = arith.constant 0 : index
    %4 = vector.load %arg2[%c0_2, %c0_3, %c0_4] : memref<4x128x1024xf32, #tpu.memory_space<vmem>>, vector<4x128x1024xf32>
    %cst = arith.constant dense<0.000000e+00> : vector<4x128xf32>
    %5 = vector.multi_reduction <add>, %4, %cst [2] : vector<4x128x1024xf32> to vector<4x128xf32>
    %6 = arith.addf %3, %5 : vector<4x128xf32>
    %c0_5 = arith.constant 0 : index
    %c0_6 = arith.constant 0 : index
    %7 = vector.load %arg5[%c0_5, %c0_6] : memref<4x128xf32, #tpu.memory_space<vmem>>, vector<4x128xf32>
    tpu.vector_store %arg5[%c0_5, %c0_6], %6 {strides = array<i32>} : memref<4x128xf32, #tpu.memory_space<vmem>>, vector<4x128xf32>,
    %c1_i32 = arith.constant 1 : i32
    %8 = arith.cmpi eq, %arg1, %c1_i32 : i32
    %9 = arith.extui %8 : i1 to i32
    %c0_i32_7 = arith.constant 0 : i32
    %10 = arith.cmpi ne, %9, %c0_i32_7 : i32
    scf.if %10 {
      %c0_8 = arith.constant 0 : index
      %c0_9 = arith.constant 0 : index
      %11 = vector.load %arg5[%c0_8, %c0_9] : memref<4x128xf32, #tpu.memory_space<vmem>>, vector<4x128xf32>
      %cst_10 = arith.constant 4.8828125E-4 : f32
      %12 = vector.broadcast %cst_10 : f32 to vector<4x128xf32>
      %13 = arith.mulf %11, %12 : vector<4x128xf32>
      %c0_11 = arith.constant 0 : index
      %c0_12 = arith.constant 0 : index
      %14 = vector.load %arg3[%c0_11, %c0_12] : memref<128x8xf32, #tpu.memory_space<vmem>>, vector<128x8xf32>
      %cst_13 = arith.constant dense<0.000000e+00> : vector<4x8xf32>
      %15 = tpu.matmul %13, %14, %cst_13 {dimension_numbers = #tpu.dot_dimension_numbers<[1], [0], [0], [1], [0, 0, 1, 1], [], []>} : vector<4x128xf32>, vector<128x8xf32>, vector<4x8xf32> -> vector<4x8xf32>
      %cst_14 = arith.constant 0.000000e+00 : f32
      %16 = vector.broadcast %cst_14 : f32 to vector<4x8xf32>
      %17 = arith.maximumf %15, %16 : vector<4x8xf32>
      %c0_15 = arith.constant 0 : index
      %c0_16 = arith.constant 0 : index
      %18 = vector.load %arg4[%c0_15, %c0_16] : memref<8x128xf32, #tpu.memory_space<vmem>>, vector<8x128xf32>
      %cst_17 = arith.constant dense<0.000000e+00> : vector<4x128xf32>
      %19 = tpu.matmul %17, %18, %cst_17 {dimension_numbers = #tpu.dot_dimension_numbers<[1], [0], [0], [1], [0, 0, 1, 1], [], []>} : vector<4x8xf32>, vector<8x128xf32>, vector<4x128xf32> -> vector<4x128xf32>
      %20 = arith.negf %19 : vector<4x128xf32>
      %21 = math.exp %20 : vector<4x128xf32>
      %cst_18 = arith.constant 1.000000e+00 : f32
      %22 = vector.broadcast %cst_18 : f32 to vector<4x128xf32>
      %23 = arith.addf %22, %21 : vector<4x128xf32>
      %24 = arith.divf %22, %23 : vector<4x128xf32>
      %c0_19 = arith.constant 0 : index
      %c0_20 = arith.constant 0 : index
      %25 = vector.load %arg5[%c0_19, %c0_20] : memref<4x128xf32, #tpu.memory_space<vmem>>, vector<4x128xf32>
      tpu.vector_store %arg5[%c0_19, %c0_20], %24 {strides = array<i32>} : memref<4x128xf32, #tpu.memory_space<vmem>>, vector<4x128xf32>,
    } else {
    }
    return
  }
  func.func @transform_0(%arg0: i32, %arg1: i32) -> (i32, i32, i32) {
    %c0_i32 = arith.constant 0 : i32
    %c0_i32_0 = arith.constant 0 : i32
    return %arg0, %c0_i32, %arg1 : i32, i32, i32
  }
  func.func @transform_1(%arg0: i32, %arg1: i32) -> (i32, i32) {
    %c0_i32 = arith.constant 0 : i32
    %c0_i32_0 = arith.constant 0 : i32
    %c0_i32_1 = arith.constant 0 : i32
    return %c0_i32, %c0_i32_0 : i32, i32
  }
  func.func @transform_2(%arg0: i32, %arg1: i32) -> (i32, i32) {
    %c0_i32 = arith.constant 0 : i32
    %c0_i32_0 = arith.constant 0 : i32
    %c0_i32_1 = arith.constant 0 : i32
    return %c0_i32, %c0_i32_0 : i32, i32
  }
  func.func @transform_3(%arg0: i32, %arg1: i32) -> (i32, i32) {
    %c0_i32 = arith.constant 0 : i32
    %c0_i32_0 = arith.constant 0 : i32
    return %arg0, %c0_i32 : i32, i32
  }
}

</mosaic_0001>

<bundles_post_ra>
// kernel: tpu_custom_call.1
= control target key start
LH: loop header
LB: loop body
LE: loop exit
PB: predicated region body
PF: predicated region fallthrough
CT: control target
= control target key end

     0   :  { %8 = vsyncpa [#allocation3], 0  ;;  %s3351_s0 = inlined_call_operand.hbm [shape: f32[4,128,2048], index: 0, kind: input, shape index: {}]   ;;  %s3352_s1 = inlined_call_operand.vmem [shape: f32[128,8], index: 1, kind: input, shape index: {}]   ;;  %s3353_s2 = inlined_call_operand.hbm [shape: f32[8,128], index: 2, kind: input, shape index: {}]   ;;  %s3354_s3 = inlined_call_operand.hbm [shape: f32[4,128], index: 3, kind: output, shape index: {}]  }
   0x1   :  { %10 = vsyncpa [#allocation3 + $0x1], 0 }
   0x2   :  { %11 = vsyncpa [#allocation6], 0 }
   0x3   :  { %12 = vsyncpa [#allocation4], 0  ;;  %s2347_s12 = smov 0   ;;  %s2349_s13 = smov 0  }
   0x4   :  { %s2351_s14 = smov 0   ;;  %s2353_s15 = smov 0  }
   0x5   :  { %s2355_s16 = smov 0   ;;  %s2357_s17 = smov 0  }
   0x6 LB: > { %s1987_s18 = sadd.s32 4294967295, %s2315_s17   ;;  %s39_s19 = sadd.s32 1, %s2303_s14  ;;  %s2315_s17 = sphi %s2357_s17, %s18_s17   ;;  %s2311_s16 = sphi %s2355_s16, %s3374_s16   ;;  %s2307_s15 = sphi %s2353_s15, %s3373_s15   ;;  %s2303_s14 = sphi %s2351_s14, %s3372_s14   ;;  %s2299_s13 = sphi %s2349_s13, %s3371_s13   ;;  %s2295_s12 = sphi %s2347_s12, %s3370_s12  }
   0x7   : > { %p46_p0 = scmp.ne.s32.totalorder %s2303_s14, %s2299_s13  ;;  %p47_p1 = scmp.eq.s32.totalorder %s2315_s17, 0 }
   0x8   : > { %p52_p2 = scmp.ne.s32.totalorder %s2299_s13, %s2295_s12  ;;  %p2383_p3 = scmp.eq.s32.totalorder %s1987_s18, 0 }
   0x9   : > { %p48_p4 = por %p47_p1, %p46_p0  ;;  %p1988_p5 = scmp.ge.s32.totalorder %s2315_s17, 1 }
   0xa   : > { %s3360_s20 = scalar_select %p2383_p3, 1, 0 }
   0xb   : > { %p2390_p6 = por %p2383_p3, %p52_p2  ;;  %p131_p7 = scmp.lt.s32.totalorder %s2315_s17, 3 }
   0xc   : > { %s2317_s23 = smov [#allocation5]   ;;  %p2108_p10 = scmp.lt.s32.totalorder %s2315_s17, 2 }
   0xd   : > { %s3361_s21 = scalar_select %p2390_p6, 1, 0 }
   0xe   : > { %p2395_p8 = pnand %p1988_p5, %p131_p7  ;;  %s147_s24 = sshll.u32 %s2317_s23, 4  ;;  %s148_s24 = int_to_ptr.vmem [resolvable:$true] %s147_s24 }
   0xf   : > { %s158_s25 = sand.u32 1, %s2303_s14   ;;  %p2409_p12 = pnand %p2108_p10, %p48_p4 }
  0x10   : > { %s3362_s22 = scalar_select %p2395_p8, 1, 0 }
  0x11   : > { %p2099_p9 = pneg %p2395_p8  ;;  %s2173_s30 = scalar_lea.hbm %s3353_s2, 128 }
  0x12   : > { %s3364_s27 = scalar_select %p2409_p12, 1, 0 }
  0x13   : > { %p2405_p11 = pnand %p2099_p9, %p2383_p3  ;;  %p2174_p13 = scmp.ne.s32.totalorder %s3353_s2, %s2173_s30 }
  0x14   : > { %p2180_p5 = scmp.lt.u32.totalorder %s2173_s30, %s3353_s2 }
  0x15   : > { %p2175_p0 = pneg %p2405_p11 }
  0x17   : > { %p2176_p1 = pnand %p2175_p0, %p2174_p13 }
  0x19   : > { %p2177_p2 = pneg %p2176_p1 }
  0x1b   : > { %p2182_p4 = pnand %p2180_p5, %p2177_p2 }
  0x1d   : > { %2185 = shalt.err (!%p2182_p4)
}
  0x1e   : > { %s2186_s8 = scalar_lea.vmem %s148_s24, 128  ;;  %p2194_p3 = scmp.lt.s32.totalorder %s148_s24, %s148_s24 }
  0x1f   : > { %p2187_p7 = scmp.ne.s32.totalorder %s148_s24, %s2186_s8  ;;  %p2195_p6 = scmp.lt.s32.totalorder %s2186_s8, %s2186_s8 }
  0x21   : > { %p2189_p9 = pnand %p2187_p7, %p2175_p0  ;;  %p2196_p8 = por %p2195_p6, %p2194_p3 }
  0x23   : > { %p2190_p10 = pneg %p2189_p9 }
  0x25   : > { %p2197_p12 = pnand %p2196_p8, %p2190_p10 }
  0x27   : > { %2200 = shalt.err (!%p2197_p12)
}
  0x28   : > { %2102 = dma.hbm_to_vmem [thread:$0]  (!%p2405_p11), %s3353_s2, 128, %s148_s24, [#allocation6]  }
  0x29   : > { %s27_s11 = sadd.s32 1, %s2311_s16  ;;  %s1991_s12 = sshll.u32 %s158_s25, 12 }
  0x2a   : > { %p28_p3 = scmp.ge.s32.totalorder %s27_s11, 2  ;;  %s2005_s23 = sshll.u32 %s2311_s16, 10 }
  0x2b   : > { %s162_s28 = scalar_lea.vmem [#allocation2], %s1991_s12  ;;  %s2438_s4 = scalar_lea.hbm %s3351_s0, %s2005_s23 }
  0x2c   : > { %s172_s26 = sshll.u32 %s162_s28, 4  ;;  %s3376_s11 = smov (%p28_p3, %s27_s11), 0  ;;  %s2440_s26 = int_to_ptr.vmem [resolvable:$true] %s172_s26 }
  0x2d   : > { %s35_s24 = ssub.s32 %s2311_s16, %s3376_s11  ;;  %s2451_s6 = scalar_lea.sflag [#allocation3], %s158_s25 }
  0x2e   : > { %p37_p6 = scmp.eq.s32.totalorder %s35_s24, 0  ;;  %s2201_s7 = scalar_lea.hbm %s2438_s4, 65536 }
  0x2f   : > { %p2202_p8 = scmp.ne.s32.totalorder %s2438_s4, %s2201_s7  ;;  %p3365_p11 = scmp.ne.s32.totalorder %s3364_s27, 0 }
  0x30   : > { %s2447_s5 = scalar_select %p37_p6, %s2303_s14, %s39_s19  }
  0x31   : > { %p2203_p12 = pneg %p3365_p11  ;;  %s2206_s10 = scalar_lea.hbm %s3351_s0, 131072 }
  0x32   : > { %p2207_p1 = scmp.lt.u32.totalorder %s2438_s4, %s3351_s0  ;;  %p2208_p2 = scmp.lt.u32.totalorder %s2206_s10, %s2201_s7 }
  0x33   : > { %p2204_p13 = pnand %p2203_p12, %p2202_p8  ;;  %p2210_p4 = scmp.lt.u32.totalorder %s2201_s7, %s2438_s4 }
  0x34   : > { %p2209_p5 = por %p2208_p2, %p2207_p1 }
  0x35   : > { %p2205_p0 = pneg %p2204_p13 }
  0x36   : > { %p2211_p7 = por %p2210_p4, %p2209_p5 }
  0x38   : > { %p2212_p9 = pnand %p2211_p7, %p2205_p0 }
  0x3a   : > { %2215 = shalt.err (!%p2212_p9)
}
  0x3b   : > { %s2216_s19 = scalar_lea.vmem %s2440_s26, 65536  ;;  %s2318_s25 = smov [#allocation2]  }
  0x3c   : > { %p2217_p10 = scmp.ne.s32.totalorder %s2440_s26, %s2216_s19  ;;  %s2221_s28 = sshll.u32 %s2318_s25, 4  ;;  %s2222_s28 = int_to_ptr.vmem [resolvable:$false] %s2221_s28 }
  0x3d   : > { %s2223_s29 = scalar_lea.vmem %s2222_s28, 131072  ;;  %p2224_p8 = scmp.lt.s32.totalorder %s2440_s26, %s2222_s28 }
  0x3e   : > { %p2219_p3 = pnand %p2217_p10, %p2203_p12  ;;  %p2225_p13 = scmp.lt.s32.totalorder %s2223_s29, %s2216_s19 }
  0x40   : > { %p2220_p6 = pneg %p2219_p3  ;;  %p2226_p1 = por %p2225_p13, %p2224_p8 }
  0x42   : > { %p2227_p2 = pnand %p2226_p1, %p2220_p6 }
  0x44   : > { %2230 = shalt.err (!%p2227_p2)
}
  0x45   : > { %s2319_s30 = smov 2048   ;;  %s2320_s24 = smov 1024  }
  0x46   : > { %s2321_s7 = smov 64   ;;  %p3366_p12 = scmp.ne.s32.totalorder %s3362_s22, 0 }
  0x47   : > { %2106 = dma.hbm_to_vmem [thread:$0]  (!%p3365_p11), %s2438_s4, 65536, %s2440_s26, %s2451_s6, %s2319_s30, %s2320_s24, %s2321_s7  }
  0x48   : > { %184 = sbr.rel (%p3366_p12) target bundleno = 926 (0x39e), region = 32  ;;  %s186_s8 = sand.u32 (!%p3366_p12), 1, %s2299_s13  }
  0x49   : > { %s1995_s9 = sshll.u32 (!%p3366_p12), %s186_s8, 12  ;;  %s187_s10 = scalar_lea.sflag (!%p3366_p12), [#allocation3], %s186_s8 }
  0x4a   : > { %s2482_s12 = scalar_lea.vmem (!%p3366_p12), [#allocation2], %s1995_s9  ;;  %p3367_p0 = scmp.ne.s32.totalorder (!%p3366_p12), %s3361_s21, 0 }
  0x4f   : > { %2282 = dma.done.wait (%p3367_p0), %s187_s10, 65536  }
  0x50   : > { %2284 = vsyncadd (%p3367_p0), %s187_s10, 4294901760  ;;  %p3368_p5 = scmp.ne.s32.totalorder %s3360_s20, 0 }
  0x52   : > { %2286 = dma.done.wait (%p3368_p5), [#allocation6], 128  }
  0x53   : > { %2288 = vsyncadd (%p3368_p5), [#allocation6], 4294967168  ;;  %p1997_p11 = scmp.ne.s32.totalorder %s2307_s15, 0 }
  0x54   : > { %v2322_v0 = vmov (!%p1997_p11), 0.0  }
  0x55   : > { %217 = sbr.rel (%p1997_p11) target bundleno = 92 (0x5c), region = 44  ;;  %218 = vst [vmem:[#allocation7] sm:$0xf] (!%p1997_p11), %v2322_v0 }
  0x5c PF: > { %v236_v1 = vld [vmem:[%s2482_s12 + $0x80] sm:$0xff]  ;;  %v237_v2 = vld [vmem:[%s2482_s12 + $0x88] sm:$0xff]  ;;  %v238_v3 = vld [vmem:[%s2482_s12 + $0x90] sm:$0xff]  ;;  %vm1383_vm0 = vcmask 130112   ;;  %vm1390_vm1 = vcmask 195712   ;;  %vm1397_vm2 = vcmask 261312  }
  0x5d   : > { %v750_v4 = vadd.f32 %v237_v2, %v236_v1  ;;  %v239_v5 = vld [vmem:[%s2482_s12 + $0x98] sm:$0xff]  ;;  %v220_v6 = vld [vmem:[%s2482_s12] sm:$0xff]  ;;  %v221_v8 = vld [vmem:[%s2482_s12 + $0x8] sm:$0xff]  ;;  %vm1404_vm3 = vcmask 326912   ;;  %vm1411_vm4 = vcmask 392512   ;;  %vm1418_vm5 = vcmask 458112  }
  0x5e   : > { %v222_v9 = vld [vmem:[%s2482_s12 + $0x10] sm:$0xff]  ;;  %v240_v10 = vld [vmem:[%s2482_s12 + $0xa0] sm:$0xff]  ;;  %v732_v11 = vadd.f32 %v221_v8, %v220_v6  ;;  %v223_v13 = vld [vmem:[%s2482_s12 + $0x18] sm:$0xff]  ;;  %vm1425_vm6 = vcmask 523712   ;;  %vm1432_vm7 = vcmask 589312   ;;  %vm1439_vm8 = vcmask 654912  }
  0x5f   : > { %v751_v7 = vadd.f32 %v750_v4, %v238_v3  ;;  %v244_v14 = vld [vmem:[%s2482_s12 + $0xc0] sm:$0xff]  ;;  %v245_v15 = vld [vmem:[%s2482_s12 + $0xc8] sm:$0xff]  ;;  %v246_v18 = vld [vmem:[%s2482_s12 + $0xd0] sm:$0xff]  ;;  %vm1446_vm9 = vcmask 720512   ;;  %vm1453_vm10 = vcmask 786112   ;;  %vm1460_vm11 = vcmask 851712  }
  0x60   : > { %v241_v16 = vld [vmem:[%s2482_s12 + $0xa8] sm:$0xff]  ;;  %v733_v17 = vadd.f32 %v732_v11, %v222_v9  ;;  %v759_v19 = vadd.f32 %v245_v15, %v244_v14  ;;  %v242_v20 = vld [vmem:[%s2482_s12 + $0xb0] sm:$0xff]  ;;  %v224_v22 = vld [vmem:[%s2482_s12 + $0x20] sm:$0xff]  ;;  %vm1467_vm12 = vcmask 917312   ;;  %vm1474_vm13 = vcmask 982912   ;;  %p1998_p4 = scmp.ne.s32.totalorder %s2307_s15, 1 }
  0x61   : > { %v752_v12 = vadd.f32 %v751_v7, %v239_v5  ;;  %v247_v23 = vld [vmem:[%s2482_s12 + $0xd8] sm:$0xff]  ;;  %v228_v26 = vld [vmem:[%s2482_s12 + $0x40] sm:$0xff]  ;;  %v229_v27 = vld [vmem:[%s2482_s12 + $0x48] sm:$0xff]  ;;  %vm1481_vm14 = vcmask 1048512   ;;  %vm1720_vm15 = vcmask 1041409  }
  0x62   : > { %v734_v24 = vadd.f32 %v733_v17, %v223_v13  ;;  %v760_v25 = vadd.f32 %v759_v19, %v246_v18  ;;  %v230_v28 = vld [vmem:[%s2482_s12 + $0x50] sm:$0xff]  ;;  %v243_v29 = vld [vmem:[%s2482_s12 + $0xb8] sm:$0xff]  ;;  %v225_v31 = vld [vmem:[%s2482_s12 + $0x28] sm:$0xff]  ;;  %v741_v33 = vadd.f32 %v229_v27, %v228_v26 }
  0x63   : > { %v753_v21 = vadd.f32 %v752_v12, %v240_v10  ;;  %v248_v32 = vld [vmem:[%s2482_s12 + $0xe0] sm:$0xff]  ;;  %v226_v34 = vld [vmem:[%s2482_s12 + $0x30] sm:$0xff]  ;;  %v231_v37 = vld [vmem:[%s2482_s12 + $0x58] sm:$0xff] }
  0x64   : > { %v735_v35 = vadd.f32 %v734_v24, %v224_v22  ;;  %v761_v36 = vadd.f32 %v760_v25, %v247_v23  ;;  %v260_v38 = vld [vmem:[%s2482_s12 + $0x140] sm:$0xff]  ;;  %v249_v40 = vld [vmem:[%s2482_s12 + $0xe8] sm:$0xff]  ;;  %v742_v41 = vadd.f32 %v741_v33, %v230_v28  ;;  %v262_v43 = vld [vmem:[%s2482_s12 + $0x150] sm:$0xff] }
  0x65   : > { %v754_v30 = vadd.f32 %v753_v21, %v241_v16  ;;  %v261_v42 = vld [vmem:[%s2482_s12 + $0x148] sm:$0xff]  ;;  %v227_v44 = vld [vmem:[%s2482_s12 + $0x38] sm:$0xff]  ;;  %v250_v46 = vld [vmem:[%s2482_s12 + $0xf0] sm:$0xff] }
  0x66   : > { %v736_v45 = vadd.f32 %v735_v35, %v225_v31  ;;  %v762_v47 = vadd.f32 %v761_v36, %v248_v32  ;;  %v232_v48 = vld [vmem:[%s2482_s12 + $0x60] sm:$0xff]  ;;  %v777_v49 = vadd.f32 %v261_v42, %v260_v38  ;;  %v743_v51 = vadd.f32 %v742_v41, %v231_v37  ;;  %v263_v52 = vld [vmem:[%s2482_s12 + $0x158] sm:$0xff]  ;;  %v253_v54 = vld [vmem:[%s2482_s12 + $0x108] sm:$0xff] }
  0x67   : > { %v755_v39 = vadd.f32 %v754_v30, %v242_v20  ;;  %v252_v53 = vld [vmem:[%s2482_s12 + $0x100] sm:$0xff]  ;;  %v251_v56 = vld [vmem:[%s2482_s12 + $0xf8] sm:$0xff]  ;;  %v233_v58 = vld [vmem:[%s2482_s12 + $0x68] sm:$0xff] }
  0x68   : > { %v737_v55 = vadd.f32 %v736_v45, %v226_v34  ;;  %v763_v57 = vadd.f32 %v762_v47, %v249_v40  ;;  %v778_v59 = vadd.f32 %v777_v49, %v262_v43  ;;  %v254_v60 = vld [vmem:[%s2482_s12 + $0x110] sm:$0xff]  ;;  %v768_v61 = vadd.f32 %v253_v54, %v252_v53  ;;  %v264_v0 = vld [vmem:[%s2482_s12 + $0x160] sm:$0xff]  ;;  %v255_v1 = vld [vmem:[%s2482_s12 + $0x118] sm:$0xff] }
  0x69   : > { %v756_v50 = vadd.f32 %v755_v39, %v243_v29  ;;  %v234_v62 = vld [vmem:[%s2482_s12 + $0x70] sm:$0xff]  ;;  %v744_v63 = vadd.f32 %v743_v51, %v232_v48  ;;  %v276_v6 = vld [vmem:[%s2482_s12 + $0x1c0] sm:$0xff]  ;;  %v277_v7 = vld [vmem:[%s2482_s12 + $0x1c8] sm:$0xff] }
  0x6a   : > { %v738_v2 = vadd.f32 %v737_v55, %v227_v44  ;;  %v764_v3 = vadd.f32 %v763_v57, %v250_v46  ;;  %v779_v4 = vadd.f32 %v778_v59, %v263_v52  ;;  %v769_v5 = vadd.f32 %v768_v61, %v254_v60  ;;  %v278_v8 = vld [vmem:[%s2482_s12 + $0x1d0] sm:$0xff]  ;;  %v235_v9 = vld [vmem:[%s2482_s12 + $0x78] sm:$0xff]  ;;  %v265_v11 = vld [vmem:[%s2482_s12 + $0x168] sm:$0xff] }
  0x6b   : > { %757 = vadd.xlane.f32.xlu1 %v756_v50  ;;  %v745_v10 = vadd.f32 %v744_v63, %v233_v58  ;;  %v256_v12 = vld [vmem:[%s2482_s12 + $0x120] sm:$0xff]  ;;  %v795_v13 = vadd.f32 %v277_v7, %v276_v6  ;;  %v266_v15 = vld [vmem:[%s2482_s12 + $0x170] sm:$0xff]  ;;  %v279_v18 = vld [vmem:[%s2482_s12 + $0x1d8] sm:$0xff] }
  0x6c   : > { %739 = vadd.xlane.f32.xlu0 %v738_v2  ;;  %v765_v14 = vadd.f32 %v764_v3, %v251_v56  ;;  %v780_v16 = vadd.f32 %v779_v4, %v264_v0  ;;  %v770_v17 = vadd.f32 %v769_v5, %v255_v1  ;;  %v268_v19 = vld [vmem:[%s2482_s12 + $0x180] sm:$0xff]  ;;  %v257_v21 = vld [vmem:[%s2482_s12 + $0x128] sm:$0xff]  ;;  %v270_v24 = vld [vmem:[%s2482_s12 + $0x190] sm:$0xff] }
  0x6d   : > { %v746_v20 = vadd.f32 %v745_v10, %v234_v62  ;;  %v796_v22 = vadd.f32 %v795_v13, %v278_v8  ;;  %v269_v23 = vld [vmem:[%s2482_s12 + $0x188] sm:$0xff]  ;;  %v267_v25 = vld [vmem:[%s2482_s12 + $0x178] sm:$0xff]  ;;  %v258_v27 = vld [vmem:[%s2482_s12 + $0x130] sm:$0xff] }
  0x6e   : > { %v781_v26 = vadd.f32 %v780_v16, %v265_v11  ;;  %v771_v28 = vadd.f32 %v770_v17, %v256_v12  ;;  %v280_v29 = vld [vmem:[%s2482_s12 + $0x1e0] sm:$0xff]  ;;  %v786_v30 = vadd.f32 %v269_v23, %v268_v19  ;;  %v271_v33 = vld [vmem:[%s2482_s12 + $0x198] sm:$0xff]  ;;  %v293_v35 = vld [vmem:[%s2482_s12 + $0x248] sm:$0xff] }
  0x6f   : > { %766 = vadd.xlane.f32.xlu1 %v765_v14  ;;  %v747_v31 = vadd.f32 %v746_v20, %v235_v9  ;;  %v797_v32 = vadd.f32 %v796_v22, %v279_v18  ;;  %v292_v34 = vld [vmem:[%s2482_s12 + $0x240] sm:$0xff]  ;;  %v259_v37 = vld [vmem:[%s2482_s12 + $0x138] sm:$0xff]  ;;  %v281_v39 = vld [vmem:[%s2482_s12 + $0x1e8] sm:$0xff] }
  0x70   : > { %v782_v36 = vadd.f32 %v781_v26, %v266_v15  ;;  %v772_v38 = vadd.f32 %v771_v28, %v257_v21  ;;  %v787_v40 = vadd.f32 %v786_v30, %v270_v24  ;;  %v294_v41 = vld [vmem:[%s2482_s12 + $0x250] sm:$0xff]  ;;  %v813_v42 = vadd.f32 %v293_v35, %v292_v34  ;;  %v272_v45 = vld [vmem:[%s2482_s12 + $0x1a0] sm:$0xff]  ;;  %v295_v46 = vld [vmem:[%s2482_s12 + $0x258] sm:$0xff] }
  0x71   : > { %748 = vadd.xlane.f32.xlu0 %v747_v31  ;;  %v282_v43 = vld [vmem:[%s2482_s12 + $0x1f0] sm:$0xff]  ;;  %v798_v44 = vadd.f32 %v797_v32, %v280_v29  ;;  %v284_v51 = vld [vmem:[%s2482_s12 + $0x200] sm:$0xff]  ;;  %v285_v52 = vld [vmem:[%s2482_s12 + $0x208] sm:$0xff] }
  0x72   : > { %v783_v47 = vadd.f32 %v782_v36, %v267_v25  ;;  %v773_v48 = vadd.f32 %v772_v38, %v258_v27  ;;  %v788_v49 = vadd.f32 %v787_v40, %v271_v33  ;;  %v814_v50 = vadd.f32 %v813_v42, %v294_v41  ;;  %v286_v53 = vld [vmem:[%s2482_s12 + $0x210] sm:$0xff]  ;;  %v283_v54 = vld [vmem:[%s2482_s12 + $0x1f8] sm:$0xff]  ;;  %v273_v56 = vld [vmem:[%s2482_s12 + $0x1a8] sm:$0xff] }
  0x73   : > { %v799_v55 = vadd.f32 %v798_v44, %v281_v39  ;;  %v296_v57 = vld [vmem:[%s2482_s12 + $0x260] sm:$0xff]  ;;  %v804_v58 = vadd.f32 %v285_v52, %v284_v51  ;;  %v274_v60 = vld [vmem:[%s2482_s12 + $0x1b0] sm:$0xff]  ;;  %v287_v63 = vld [vmem:[%s2482_s12 + $0x218] sm:$0xff] }
  0x74   : > { %784 = vadd.xlane.f32.xlu1 %v783_v47  ;;  %v774_v59 = vadd.f32 %v773_v48, %v259_v37  ;;  %v789_v61 = vadd.f32 %v788_v49, %v272_v45  ;;  %v815_v62 = vadd.f32 %v814_v50, %v295_v46  ;;  %v308_v0 = vld [vmem:[%s2482_s12 + $0x2c0] sm:$0xff]  ;;  %v297_v2 = vld [vmem:[%s2482_s12 + $0x268] sm:$0xff]  ;;  %v310_v5 = vld [vmem:[%s2482_s12 + $0x2d0] sm:$0xff] }
  0x75   : > { %v800_v1 = vadd.f32 %v799_v55, %v282_v43  ;;  %v805_v3 = vadd.f32 %v804_v58, %v286_v53  ;;  %v309_v4 = vld [vmem:[%s2482_s12 + $0x2c8] sm:$0xff]  ;;  %v275_v6 = vld [vmem:[%s2482_s12 + $0x1b8] sm:$0xff]  ;;  %v298_v8 = vld [vmem:[%s2482_s12 + $0x270] sm:$0xff] }
  0x76   : > { %775 = vadd.xlane.f32.xlu0 %v774_v59  ;;  %v790_v7 = vadd.f32 %v789_v61, %v273_v56  ;;  %v816_v9 = vadd.f32 %v815_v62, %v296_v57  ;;  %v288_v10 = vld [vmem:[%s2482_s12 + $0x220] sm:$0xff]  ;;  %v831_v11 = vadd.f32 %v309_v4, %v308_v0  ;;  %v311_v14 = vld [vmem:[%s2482_s12 + $0x2d8] sm:$0xff]  ;;  %v301_v16 = vld [vmem:[%s2482_s12 + $0x288] sm:$0xff] }
  0x77   : > { %v801_v12 = vadd.f32 %v800_v1, %v283_v54  ;;  %v806_v13 = vadd.f32 %v805_v3, %v287_v63  ;;  %v300_v15 = vld [vmem:[%s2482_s12 + $0x280] sm:$0xff]  ;;  %v299_v18 = vld [vmem:[%s2482_s12 + $0x278] sm:$0xff]  ;;  %v289_v20 = vld [vmem:[%s2482_s12 + $0x228] sm:$0xff] }
  0x78   : > { %v791_v17 = vadd.f32 %v790_v7, %v274_v60  ;;  %v817_v19 = vadd.f32 %v816_v9, %v297_v2  ;;  %v832_v21 = vadd.f32 %v831_v11, %v310_v5  ;;  %v302_v22 = vld [vmem:[%s2482_s12 + $0x290] sm:$0xff]  ;;  %v822_v23 = vadd.f32 %v301_v16, %v300_v15  ;;  %v312_v26 = vld [vmem:[%s2482_s12 + $0x2e0] sm:$0xff]  ;;  %v303_v27 = vld [vmem:[%s2482_s12 + $0x298] sm:$0xff] }
  0x79   : > { %802 = vadd.xlane.f32.xlu1 %v801_v12  ;;  %v290_v24 = vld [vmem:[%s2482_s12 + $0x230] sm:$0xff]  ;;  %v807_v25 = vadd.f32 %v806_v13, %v288_v10  ;;  %v324_v32 = vld [vmem:[%s2482_s12 + $0x340] sm:$0xff]  ;;  %v325_v33 = vld [vmem:[%s2482_s12 + $0x348] sm:$0xff] }
  0x7a   : > { %v792_v28 = vadd.f32 %v791_v17, %v275_v6  ;;  %v818_v29 = vadd.f32 %v817_v19, %v298_v8  ;;  %v833_v30 = vadd.f32 %v832_v21, %v311_v14  ;;  %v823_v31 = vadd.f32 %v822_v23, %v302_v22  ;;  %v326_v34 = vld [vmem:[%s2482_s12 + $0x350] sm:$0xff]  ;;  %v291_v35 = vld [vmem:[%s2482_s12 + $0x238] sm:$0xff]  ;;  %v313_v37 = vld [vmem:[%s2482_s12 + $0x2e8] sm:$0xff] }
  0x7b   : > { %v808_v36 = vadd.f32 %v807_v25, %v289_v20  ;;  %v304_v38 = vld [vmem:[%s2482_s12 + $0x2a0] sm:$0xff]  ;;  %v849_v39 = vadd.f32 %v325_v33, %v324_v32  ;;  %v314_v41 = vld [vmem:[%s2482_s12 + $0x2f0] sm:$0xff]  ;;  %v327_v44 = vld [vmem:[%s2482_s12 + $0x358] sm:$0xff] }
  0x7c   : > { %793 = vadd.xlane.f32.xlu0 %v792_v28  ;;  %v819_v40 = vadd.f32 %v818_v29, %v299_v18  ;;  %v834_v42 = vadd.f32 %v833_v30, %v312_v26  ;;  %v824_v43 = vadd.f32 %v823_v31, %v303_v27  ;;  %v316_v45 = vld [vmem:[%s2482_s12 + $0x300] sm:$0xff]  ;;  %v305_v47 = vld [vmem:[%s2482_s12 + $0x2a8] sm:$0xff]  ;;  %v318_v50 = vld [vmem:[%s2482_s12 + $0x310] sm:$0xff] }
  0x7d   : > { %v809_v46 = vadd.f32 %v808_v36, %v290_v24  ;;  %v850_v48 = vadd.f32 %v849_v39, %v326_v34  ;;  %v317_v49 = vld [vmem:[%s2482_s12 + $0x308] sm:$0xff]  ;;  %v315_v51 = vld [vmem:[%s2482_s12 + $0x2f8] sm:$0xff]  ;;  %v306_v53 = vld [vmem:[%s2482_s12 + $0x2b0] sm:$0xff] }
  0x7e   : > { %820 = vadd.xlane.f32.xlu1 %v819_v40  ;;  %v835_v52 = vadd.f32 %v834_v42, %v313_v37  ;;  %v825_v54 = vadd.f32 %v824_v43, %v304_v38  ;;  %v328_v55 = vld [vmem:[%s2482_s12 + $0x360] sm:$0xff]  ;;  %v840_v56 = vadd.f32 %v317_v49, %v316_v45  ;;  %v319_v59 = vld [vmem:[%s2482_s12 + $0x318] sm:$0xff]  ;;  %v341_v61 = vld [vmem:[%s2482_s12 + $0x3c8] sm:$0xff] }
  0x7f   : > { %v810_v57 = vadd.f32 %v809_v46, %v291_v35  ;;  %v851_v58 = vadd.f32 %v850_v48, %v327_v44  ;;  %v340_v60 = vld [vmem:[%s2482_s12 + $0x3c0] sm:$0xff]  ;;  %v307_v63 = vld [vmem:[%s2482_s12 + $0x2b8] sm:$0xff]  ;;  %v329_v1 = vld [vmem:[%s2482_s12 + $0x368] sm:$0xff] }
  0x80   : > { %v836_v62 = vadd.f32 %v835_v52, %v314_v41  ;;  %v826_v0 = vadd.f32 %v825_v54, %v305_v47  ;;  %v841_v2 = vadd.f32 %v840_v56, %v318_v50  ;;  %v342_v3 = vld [vmem:[%s2482_s12 + $0x3d0] sm:$0xff]  ;;  %v867_v4 = vadd.f32 %v341_v61, %v340_v60  ;;  %v320_v7 = vld [vmem:[%s2482_s12 + $0x320] sm:$0xff]  ;;  %v343_v8 = vld [vmem:[%s2482_s12 + $0x3d8] sm:$0xff] }
  0x81   : > { %811 = vadd.xlane.f32.xlu0 %v810_v57  ;;  %v330_v5 = vld [vmem:[%s2482_s12 + $0x370] sm:$0xff]  ;;  %v852_v6 = vadd.f32 %v851_v58, %v328_v55  ;;  %v332_v13 = vld [vmem:[%s2482_s12 + $0x380] sm:$0xff]  ;;  %v333_v14 = vld [vmem:[%s2482_s12 + $0x388] sm:$0xff] }
  0x82   : > { %v837_v9 = vadd.f32 %v836_v62, %v315_v51  ;;  %v827_v10 = vadd.f32 %v826_v0, %v306_v53  ;;  %v842_v11 = vadd.f32 %v841_v2, %v319_v59  ;;  %v868_v12 = vadd.f32 %v867_v4, %v342_v3  ;;  %v334_v15 = vld [vmem:[%s2482_s12 + $0x390] sm:$0xff]  ;;  %v331_v16 = vld [vmem:[%s2482_s12 + $0x378] sm:$0xff]  ;;  %v321_v18 = vld [vmem:[%s2482_s12 + $0x328] sm:$0xff] }
  0x83   : > { %v853_v17 = vadd.f32 %v852_v6, %v329_v1  ;;  %v344_v19 = vld [vmem:[%s2482_s12 + $0x3e0] sm:$0xff]  ;;  %v858_v20 = vadd.f32 %v333_v14, %v332_v13  ;;  %v322_v22 = vld [vmem:[%s2482_s12 + $0x330] sm:$0xff]  ;;  %v335_v25 = vld [vmem:[%s2482_s12 + $0x398] sm:$0xff] }
  0x84   : > { %838 = vadd.xlane.f32.xlu1 %v837_v9  ;;  %v828_v21 = vadd.f32 %v827_v10, %v307_v63  ;;  %v843_v23 = vadd.f32 %v842_v11, %v320_v7  ;;  %v869_v24 = vadd.f32 %v868_v12, %v343_v8  ;;  %v356_v26 = vld [vmem:[%s2482_s12 + $0x440] sm:$0xff]  ;;  %v345_v28 = vld [vmem:[%s2482_s12 + $0x3e8] sm:$0xff]  ;;  %v358_v31 = vld [vmem:[%s2482_s12 + $0x450] sm:$0xff] }
  0x85   : > { %v854_v27 = vadd.f32 %v853_v17, %v330_v5  ;;  %v859_v29 = vadd.f32 %v858_v20, %v334_v15  ;;  %v357_v30 = vld [vmem:[%s2482_s12 + $0x448] sm:$0xff]  ;;  %v323_v32 = vld [vmem:[%s2482_s12 + $0x338] sm:$0xff]  ;;  %v346_v34 = vld [vmem:[%s2482_s12 + $0x3f0] sm:$0xff] }
  0x86   : > { %829 = vadd.xlane.f32.xlu0 %v828_v21  ;;  %v844_v33 = vadd.f32 %v843_v23, %v321_v18  ;;  %v870_v35 = vadd.f32 %v869_v24, %v344_v19  ;;  %v336_v36 = vld [vmem:[%s2482_s12 + $0x3a0] sm:$0xff]  ;;  %v885_v37 = vadd.f32 %v357_v30, %v356_v26  ;;  %v359_v40 = vld [vmem:[%s2482_s12 + $0x458] sm:$0xff]  ;;  %v349_v42 = vld [vmem:[%s2482_s12 + $0x408] sm:$0xff] }
  0x87   : > { %v855_v38 = vadd.f32 %v854_v27, %v331_v16  ;;  %v860_v39 = vadd.f32 %v859_v29, %v335_v25  ;;  %v348_v41 = vld [vmem:[%s2482_s12 + $0x400] sm:$0xff]  ;;  %v347_v44 = vld [vmem:[%s2482_s12 + $0x3f8] sm:$0xff]  ;;  %v337_v46 = vld [vmem:[%s2482_s12 + $0x3a8] sm:$0xff] }
  0x88   : > { %v845_v43 = vadd.f32 %v844_v33, %v322_v22  ;;  %v871_v45 = vadd.f32 %v870_v35, %v345_v28  ;;  %v886_v47 = vadd.f32 %v885_v37, %v358_v31  ;;  %v350_v48 = vld [vmem:[%s2482_s12 + $0x410] sm:$0xff]  ;;  %v876_v49 = vadd.f32 %v349_v42, %v348_v41  ;;  %v360_v52 = vld [vmem:[%s2482_s12 + $0x460] sm:$0xff]  ;;  %v351_v53 = vld [vmem:[%s2482_s12 + $0x418] sm:$0xff] }
  0x89   : > { %856 = vadd.xlane.f32.xlu1 %v855_v38  ;;  %v338_v50 = vld [vmem:[%s2482_s12 + $0x3b0] sm:$0xff]  ;;  %v861_v51 = vadd.f32 %v860_v39, %v336_v36  ;;  %v476_v58 = vld [vmem:[%s2482_s12 + $0x800] sm:$0xff]  ;;  %v477_v59 = vld [vmem:[%s2482_s12 + $0x808] sm:$0xff] }
  0x8a   : > { %v846_v54 = vadd.f32 %v845_v43, %v323_v32  ;;  %v872_v55 = vadd.f32 %v871_v45, %v346_v34  ;;  %v887_v56 = vadd.f32 %v886_v47, %v359_v40  ;;  %v877_v57 = vadd.f32 %v876_v49, %v350_v48  ;;  %v478_v60 = vld [vmem:[%s2482_s12 + $0x810] sm:$0xff]  ;;  %v339_v61 = vld [vmem:[%s2482_s12 + $0x3b8] sm:$0xff]  ;;  %v361_v63 = vld [vmem:[%s2482_s12 + $0x468] sm:$0xff] }
  0x8b   : > { %v862_v62 = vadd.f32 %v861_v51, %v337_v46  ;;  %v352_v0 = vld [vmem:[%s2482_s12 + $0x420] sm:$0xff]  ;;  %v1020_v1 = vadd.f32 %v477_v59, %v476_v58  ;;  %v362_v3 = vld [vmem:[%s2482_s12 + $0x470] sm:$0xff]  ;;  %v479_v6 = vld [vmem:[%s2482_s12 + $0x818] sm:$0xff] }
  0x8c   : > { %847 = vadd.xlane.f32.xlu0 %v846_v54  ;;  %v873_v2 = vadd.f32 %v872_v55, %v347_v44  ;;  %v888_v4 = vadd.f32 %v887_v56, %v360_v52  ;;  %v878_v5 = vadd.f32 %v877_v57, %v351_v53  ;;  %v364_v7 = vld [vmem:[%s2482_s12 + $0x480] sm:$0xff]  ;;  %v353_v9 = vld [vmem:[%s2482_s12 + $0x428] sm:$0xff]  ;;  %v366_v12 = vld [vmem:[%s2482_s12 + $0x490] sm:$0xff] }
  0x8d   : > { %v863_v8 = vadd.f32 %v862_v62, %v338_v50  ;;  %v1021_v10 = vadd.f32 %v1020_v1, %v478_v60  ;;  %v365_v11 = vld [vmem:[%s2482_s12 + $0x488] sm:$0xff]  ;;  %v363_v13 = vld [vmem:[%s2482_s12 + $0x478] sm:$0xff]  ;;  %v354_v15 = vld [vmem:[%s2482_s12 + $0x430] sm:$0xff] }
  0x8e   : > { %874 = vadd.xlane.f32.xlu1 %v873_v2  ;;  %v889_v14 = vadd.f32 %v888_v4, %v361_v63  ;;  %v879_v16 = vadd.f32 %v878_v5, %v352_v0  ;;  %v480_v17 = vld [vmem:[%s2482_s12 + $0x820] sm:$0xff]  ;;  %v894_v18 = vadd.f32 %v365_v11, %v364_v7  ;;  %v367_v21 = vld [vmem:[%s2482_s12 + $0x498] sm:$0xff]  ;;  %v373_v23 = vld [vmem:[%s2482_s12 + $0x4c8] sm:$0xff] }
  0x8f   : > { %v864_v19 = vadd.f32 %v863_v8, %v339_v61  ;;  %v1022_v20 = vadd.f32 %v1021_v10, %v479_v6  ;;  %v372_v22 = vld [vmem:[%s2482_s12 + $0x4c0] sm:$0xff]  ;;  %v355_v25 = vld [vmem:[%s2482_s12 + $0x438] sm:$0xff]  ;;  %v481_v27 = vld [vmem:[%s2482_s12 + $0x828] sm:$0xff] }
  0x90   : > { %v890_v24 = vadd.f32 %v889_v14, %v362_v3  ;;  %v880_v26 = vadd.f32 %v879_v16, %v353_v9  ;;  %v895_v28 = vadd.f32 %v894_v18, %v366_v12  ;;  %v374_v29 = vld [vmem:[%s2482_s12 + $0x4d0] sm:$0xff]  ;;  %v903_v30 = vadd.f32 %v373_v23, %v372_v22  ;;  %v368_v33 = vld [vmem:[%s2482_s12 + $0x4a0] sm:$0xff]  ;;  %v375_v34 = vld [vmem:[%s2482_s12 + $0x4d8] sm:$0xff] }
  0x91   : > { %865 = vadd.xlane.f32.xlu0 %v864_v19  ;;  %v482_v31 = vld [vmem:[%s2482_s12 + $0x830] sm:$0xff]  ;;  %v1023_v32 = vadd.f32 %v1022_v20, %v480_v17  ;;  %v484_v39 = vld [vmem:[%s2482_s12 + $0x840] sm:$0xff]  ;;  %v485_v40 = vld [vmem:[%s2482_s12 + $0x848] sm:$0xff] }
  0x92   : > { %v891_v35 = vadd.f32 %v890_v24, %v363_v13  ;;  %v881_v36 = vadd.f32 %v880_v26, %v354_v15  ;;  %v896_v37 = vadd.f32 %v895_v28, %v367_v21  ;;  %v904_v38 = vadd.f32 %v903_v30, %v374_v29  ;;  %v486_v41 = vld [vmem:[%s2482_s12 + $0x850] sm:$0xff]  ;;  %v483_v42 = vld [vmem:[%s2482_s12 + $0x838] sm:$0xff]  ;;  %v369_v44 = vld [vmem:[%s2482_s12 + $0x4a8] sm:$0xff] }
  0x93   : > { %v1024_v43 = vadd.f32 %v1023_v32, %v481_v27  ;;  %v376_v45 = vld [vmem:[%s2482_s12 + $0x4e0] sm:$0xff]  ;;  %v1029_v46 = vadd.f32 %v485_v40, %v484_v39  ;;  %v370_v48 = vld [vmem:[%s2482_s12 + $0x4b0] sm:$0xff]  ;;  %v487_v51 = vld [vmem:[%s2482_s12 + $0x858] sm:$0xff] }
  0x94   : > { %892 = vadd.xlane.f32.xlu1 %v891_v35  ;;  %v882_v47 = vadd.f32 %v881_v36, %v355_v25  ;;  %v897_v49 = vadd.f32 %v896_v37, %v368_v33  ;;  %v905_v50 = vadd.f32 %v904_v38, %v375_v34  ;;  %v604_v52 = vld [vmem:[%s2482_s12 + $0xc00] sm:$0xff]  ;;  %v377_v54 = vld [vmem:[%s2482_s12 + $0x4e8] sm:$0xff]  ;;  %v606_v57 = vld [vmem:[%s2482_s12 + $0xc10] sm:$0xff] }
  0x95   : > { %v1025_v53 = vadd.f32 %v1024_v43, %v482_v31  ;;  %v1030_v55 = vadd.f32 %v1029_v46, %v486_v41  ;;  %v605_v56 = vld [vmem:[%s2482_s12 + $0xc08] sm:$0xff]  ;;  %v371_v58 = vld [vmem:[%s2482_s12 + $0x4b8] sm:$0xff]  ;;  %v378_v60 = vld [vmem:[%s2482_s12 + $0x4f0] sm:$0xff] }
  0x96   : > { %883 = vadd.xlane.f32.xlu0 %v882_v47  ;;  %v898_v59 = vadd.f32 %v897_v49, %v369_v44  ;;  %v906_v61 = vadd.f32 %v905_v50, %v376_v45  ;;  %v488_v62 = vld [vmem:[%s2482_s12 + $0x860] sm:$0xff]  ;;  %v1164_v63 = vadd.f32 %v605_v56, %v604_v52  ;;  %v607_v2 = vld [vmem:[%s2482_s12 + $0xc18] sm:$0xff]  ;;  %v493_v4 = vld [vmem:[%s2482_s12 + $0x888] sm:$0xff] }
  0x97   : > { %v1026_v0 = vadd.f32 %v1025_v53, %v483_v42  ;;  %v1031_v1 = vadd.f32 %v1030_v55, %v487_v51  ;;  %v492_v3 = vld [vmem:[%s2482_s12 + $0x880] sm:$0xff]  ;;  %v379_v6 = vld [vmem:[%s2482_s12 + $0x4f8] sm:$0xff]  ;;  %v489_v8 = vld [vmem:[%s2482_s12 + $0x868] sm:$0xff] }
  0x98   : > { %v899_v5 = vadd.f32 %v898_v59, %v370_v48  ;;  %v907_v7 = vadd.f32 %v906_v61, %v377_v54  ;;  %v1165_v9 = vadd.f32 %v1164_v63, %v606_v57  ;;  %v494_v10 = vld [vmem:[%s2482_s12 + $0x890] sm:$0xff]  ;;  %v1038_v11 = vadd.f32 %v493_v4, %v492_v3  ;;  %v608_v14 = vld [vmem:[%s2482_s12 + $0xc20] sm:$0xff]  ;;  %v495_v15 = vld [vmem:[%s2482_s12 + $0x898] sm:$0xff] }
  0x99   : > { %1027 = vadd.xlane.f32.xlu1 %v1026_v0  ;;  %v490_v12 = vld [vmem:[%s2482_s12 + $0x870] sm:$0xff]  ;;  %v1032_v13 = vadd.f32 %v1031_v1, %v488_v62  ;;  %v380_v20 = vld [vmem:[%s2482_s12 + $0x500] sm:$0xff]  ;;  %v381_v21 = vld [vmem:[%s2482_s12 + $0x508] sm:$0xff] }
  0x9a   : > { %v900_v16 = vadd.f32 %v899_v5, %v371_v58  ;;  %v908_v17 = vadd.f32 %v907_v7, %v378_v60  ;;  %v1166_v18 = vadd.f32 %v1165_v9, %v607_v2  ;;  %v1039_v19 = vadd.f32 %v1038_v11, %v494_v10  ;;  %v382_v22 = vld [vmem:[%s2482_s12 + $0x510] sm:$0xff]  ;;  %v491_v23 = vld [vmem:[%s2482_s12 + $0x878] sm:$0xff]  ;;  %v609_v25 = vld [vmem:[%s2482_s12 + $0xc28] sm:$0xff] }
  0x9b   : > { %v1033_v24 = vadd.f32 %v1032_v13, %v489_v8  ;;  %v496_v26 = vld [vmem:[%s2482_s12 + $0x8a0] sm:$0xff]  ;;  %v912_v27 = vadd.f32 %v381_v21, %v380_v20  ;;  %v610_v29 = vld [vmem:[%s2482_s12 + $0xc30] sm:$0xff]  ;;  %v383_v32 = vld [vmem:[%s2482_s12 + $0x518] sm:$0xff] }
  0x9c   : > { %901 = vadd.xlane.f32.xlu0 %v900_v16  ;;  %v909_v28 = vadd.f32 %v908_v17, %v379_v6  ;;  %v1167_v30 = vadd.f32 %v1166_v18, %v608_v14  ;;  %v1040_v31 = vadd.f32 %v1039_v19, %v495_v15  ;;  %v612_v33 = vld [vmem:[%s2482_s12 + $0xc40] sm:$0xff]  ;;  %v497_v35 = vld [vmem:[%s2482_s12 + $0x8a8] sm:$0xff]  ;;  %v614_v38 = vld [vmem:[%s2482_s12 + $0xc50] sm:$0xff] }
  0x9d   : > { %v1034_v34 = vadd.f32 %v1033_v24, %v490_v12  ;;  %v913_v36 = vadd.f32 %v912_v27, %v382_v22  ;;  %v613_v37 = vld [vmem:[%s2482_s12 + $0xc48] sm:$0xff]  ;;  %v611_v39 = vld [vmem:[%s2482_s12 + $0xc38] sm:$0xff]  ;;  %v498_v41 = vld [vmem:[%s2482_s12 + $0x8b0] sm:$0xff] }
  0x9e   : > { %910 = vadd.xlane.f32.xlu1 %v909_v28  ;;  %v1168_v40 = vadd.f32 %v1167_v30, %v609_v25  ;;  %v1041_v42 = vadd.f32 %v1040_v31, %v496_v26  ;;  %v384_v43 = vld [vmem:[%s2482_s12 + $0x520] sm:$0xff]  ;;  %v1173_v44 = vadd.f32 %v613_v37, %v612_v33  ;;  %v615_v47 = vld [vmem:[%s2482_s12 + $0xc58] sm:$0xff]  ;;  %v621_v49 = vld [vmem:[%s2482_s12 + $0xc88] sm:$0xff] }
  0x9f   : > { %v1035_v45 = vadd.f32 %v1034_v34, %v491_v23  ;;  %v914_v46 = vadd.f32 %v913_v36, %v383_v32  ;;  %v620_v48 = vld [vmem:[%s2482_s12 + $0xc80] sm:$0xff]  ;;  %v499_v51 = vld [vmem:[%s2482_s12 + $0x8b8] sm:$0xff]  ;;  %v385_v53 = vld [vmem:[%s2482_s12 + $0x528] sm:$0xff] }
  0xa0   : > { %v1169_v50 = vadd.f32 %v1168_v40, %v610_v29  ;;  %v1042_v52 = vadd.f32 %v1041_v42, %v497_v35  ;;  %v1174_v54 = vadd.f32 %v1173_v44, %v614_v38  ;;  %v622_v55 = vld [vmem:[%s2482_s12 + $0xc90] sm:$0xff]  ;;  %v1182_v56 = vadd.f32 %v621_v49, %v620_v48  ;;  %v616_v59 = vld [vmem:[%s2482_s12 + $0xc60] sm:$0xff]  ;;  %v623_v60 = vld [vmem:[%s2482_s12 + $0xc98] sm:$0xff] }
  0xa1   : > { %1036 = vadd.xlane.f32.xlu0 %v1035_v45  ;;  %v386_v57 = vld [vmem:[%s2482_s12 + $0x530] sm:$0xff]  ;;  %v915_v58 = vadd.f32 %v914_v46, %v384_v43  ;;  %v500_v1 = vld [vmem:[%s2482_s12 + $0x8c0] sm:$0xff]  ;;  %v501_v2 = vld [vmem:[%s2482_s12 + $0x8c8] sm:$0xff] }
  0xa2   : > { %v1170_v61 = vadd.f32 %v1169_v50, %v611_v39  ;;  %v1043_v62 = vadd.f32 %v1042_v52, %v498_v41  ;;  %v1175_v63 = vadd.f32 %v1174_v54, %v615_v47  ;;  %v1183_v0 = vadd.f32 %v1182_v56, %v622_v55  ;;  %v502_v3 = vld [vmem:[%s2482_s12 + $0x8d0] sm:$0xff]  ;;  %v387_v4 = vld [vmem:[%s2482_s12 + $0x538] sm:$0xff]  ;;  %v617_v6 = vld [vmem:[%s2482_s12 + $0xc68] sm:$0xff] }
  0xa3   : > { %v916_v5 = vadd.f32 %v915_v58, %v385_v53  ;;  %v624_v7 = vld [vmem:[%s2482_s12 + $0xca0] sm:$0xff]  ;;  %v1047_v8 = vadd.f32 %v501_v2, %v500_v1  ;;  %v618_v10 = vld [vmem:[%s2482_s12 + $0xc70] sm:$0xff]  ;;  %v503_v13 = vld [vmem:[%s2482_s12 + $0x8d8] sm:$0xff] }
  0xa4   : > { %1171 = vadd.xlane.f32.xlu1 %v1170_v61  ;;  %v1044_v9 = vadd.f32 %v1043_v62, %v499_v51  ;;  %v1176_v11 = vadd.f32 %v1175_v63, %v616_v59  ;;  %v1184_v12 = vadd.f32 %v1183_v0, %v623_v60  ;;  %v508_v14 = vld [vmem:[%s2482_s12 + $0x900] sm:$0xff]  ;;  %v625_v16 = vld [vmem:[%s2482_s12 + $0xca8] sm:$0xff]  ;;  %v510_v19 = vld [vmem:[%s2482_s12 + $0x910] sm:$0xff] }
  0xa5   : > { %v917_v15 = vadd.f32 %v916_v5, %v386_v57  ;;  %v1048_v17 = vadd.f32 %v1047_v8, %v502_v3  ;;  %v509_v18 = vld [vmem:[%s2482_s12 + $0x908] sm:$0xff]  ;;  %v619_v20 = vld [vmem:[%s2482_s12 + $0xc78] sm:$0xff]  ;;  %v626_v22 = vld [vmem:[%s2482_s12 + $0xcb0] sm:$0xff] }
  0xa6   : > { %1045 = vadd.xlane.f32.xlu0 %v1044_v9  ;;  %v1177_v21 = vadd.f32 %v1176_v11, %v617_v6  ;;  %v1185_v23 = vadd.f32 %v1184_v12, %v624_v7  ;;  %v504_v24 = vld [vmem:[%s2482_s12 + $0x8e0] sm:$0xff]  ;;  %v1056_v25 = vadd.f32 %v509_v18, %v508_v14  ;;  %v511_v28 = vld [vmem:[%s2482_s12 + $0x918] sm:$0xff]  ;;  %v389_v30 = vld [vmem:[%s2482_s12 + $0x548] sm:$0xff] }
  0xa7   : > { %v918_v26 = vadd.f32 %v917_v15, %v387_v4  ;;  %v1049_v27 = vadd.f32 %v1048_v17, %v503_v13  ;;  %v388_v29 = vld [vmem:[%s2482_s12 + $0x540] sm:$0xff]  ;;  %v627_v32 = vld [vmem:[%s2482_s12 + $0xcb8] sm:$0xff]  ;;  %v505_v34 = vld [vmem:[%s2482_s12 + $0x8e8] sm:$0xff] }
  0xa8   : > { %v1178_v31 = vadd.f32 %v1177_v21, %v618_v10  ;;  %v1186_v33 = vadd.f32 %v1185_v23, %v625_v16  ;;  %v1057_v35 = vadd.f32 %v1056_v25, %v510_v19  ;;  %v390_v36 = vld [vmem:[%s2482_s12 + $0x550] sm:$0xff]  ;;  %v921_v37 = vadd.f32 %v389_v30, %v388_v29  ;;  %v512_v40 = vld [vmem:[%s2482_s12 + $0x920] sm:$0xff]  ;;  %v391_v41 = vld [vmem:[%s2482_s12 + $0x558] sm:$0xff] }
  0xa9   : > { %919 = vadd.xlane.f32.xlu1 %v918_v26  ;;  %v506_v38 = vld [vmem:[%s2482_s12 + $0x8f0] sm:$0xff]  ;;  %v1050_v39 = vadd.f32 %v1049_v27, %v504_v24  ;;  %v396_v46 = vld [vmem:[%s2482_s12 + $0x580] sm:$0xff]  ;;  %v397_v47 = vld [vmem:[%s2482_s12 + $0x588] sm:$0xff] }
  0xaa   : > { %v1179_v42 = vadd.f32 %v1178_v31, %v619_v20  ;;  %v1187_v43 = vadd.f32 %v1186_v33, %v626_v22  ;;  %v1058_v44 = vadd.f32 %v1057_v35, %v511_v28  ;;  %v922_v45 = vadd.f32 %v921_v37, %v390_v36  ;;  %v398_v48 = vld [vmem:[%s2482_s12 + $0x590] sm:$0xff]  ;;  %v507_v49 = vld [vmem:[%s2482_s12 + $0x8f8] sm:$0xff]  ;;  %v513_v51 = vld [vmem:[%s2482_s12 + $0x928] sm:$0xff] }
  0xab   : > { %v1051_v50 = vadd.f32 %v1050_v39, %v505_v34  ;;  %v392_v52 = vld [vmem:[%s2482_s12 + $0x560] sm:$0xff]  ;;  %v930_v53 = vadd.f32 %v397_v47, %v396_v46  ;;  %v514_v55 = vld [vmem:[%s2482_s12 + $0x930] sm:$0xff]  ;;  %v399_v58 = vld [vmem:[%s2482_s12 + $0x598] sm:$0xff] }
  0xac   : > { %1180 = vadd.xlane.f32.xlu0 %v1179_v42  ;;  %v1188_v54 = vadd.f32 %v1187_v43, %v627_v32  ;;  %v1059_v56 = vadd.f32 %v1058_v44, %v512_v40  ;;  %v923_v57 = vadd.f32 %v922_v45, %v391_v41  ;;  %v628_v59 = vld [vmem:[%s2482_s12 + $0xcc0] sm:$0xff]  ;;  %v393_v61 = vld [vmem:[%s2482_s12 + $0x568] sm:$0xff]  ;;  %v630_v0 = vld [vmem:[%s2482_s12 + $0xcd0] sm:$0xff] }
  0xad   : > { %v1052_v60 = vadd.f32 %v1051_v50, %v506_v38  ;;  %v931_v62 = vadd.f32 %v930_v53, %v398_v48  ;;  %v629_v63 = vld [vmem:[%s2482_s12 + $0xcc8] sm:$0xff]  ;;  %v515_v1 = vld [vmem:[%s2482_s12 + $0x938] sm:$0xff]  ;;  %v394_v3 = vld [vmem:[%s2482_s12 + $0x570] sm:$0xff] }
  0xae   : > { %1189 = vadd.xlane.f32.xlu1 %v1188_v54  ;;  %v1060_v2 = vadd.f32 %v1059_v56, %v513_v51  ;;  %v924_v4 = vadd.f32 %v923_v57, %v392_v52  ;;  %v400_v5 = vld [vmem:[%s2482_s12 + $0x5a0] sm:$0xff]  ;;  %v1191_v6 = vadd.f32 %v629_v63, %v628_v59  ;;  %v631_v9 = vld [vmem:[%s2482_s12 + $0xcd8] sm:$0xff]  ;;  %v637_v11 = vld [vmem:[%s2482_s12 + $0xd08] sm:$0xff] }
  0xaf   : > { %v1053_v7 = vadd.f32 %v1052_v60, %v507_v49  ;;  %v932_v8 = vadd.f32 %v931_v62, %v399_v58  ;;  %v636_v10 = vld [vmem:[%s2482_s12 + $0xd00] sm:$0xff]  ;;  %v395_v13 = vld [vmem:[%s2482_s12 + $0x578] sm:$0xff]  ;;  %v401_v15 = vld [vmem:[%s2482_s12 + $0x5a8] sm:$0xff] }
  0xb0   : > { %v1061_v12 = vadd.f32 %v1060_v2, %v514_v55  ;;  %v925_v14 = vadd.f32 %v924_v4, %v393_v61  ;;  %v1192_v16 = vadd.f32 %v1191_v6, %v630_v0  ;;  %v638_v17 = vld [vmem:[%s2482_s12 + $0xd10] sm:$0xff]  ;;  %v1200_v18 = vadd.f32 %v637_v11, %v636_v10  ;;  %v632_v21 = vld [vmem:[%s2482_s12 + $0xce0] sm:$0xff]  ;;  %v639_v22 = vld [vmem:[%s2482_s12 + $0xd18] sm:$0xff] }
  0xb1   : > { %1054 = vadd.xlane.f32.xlu0 %v1053_v7  ;;  %v402_v19 = vld [vmem:[%s2482_s12 + $0x5b0] sm:$0xff]  ;;  %v933_v20 = vadd.f32 %v932_v8, %v400_v5  ;;  %v516_v27 = vld [vmem:[%s2482_s12 + $0x940] sm:$0xff]  ;;  %v517_v28 = vld [vmem:[%s2482_s12 + $0x948] sm:$0xff] }
  0xb2   : > { %v1062_v23 = vadd.f32 %v1061_v12, %v515_v1  ;;  %v926_v24 = vadd.f32 %v925_v14, %v394_v3  ;;  %v1193_v25 = vadd.f32 %v1192_v16, %v631_v9  ;;  %v1201_v26 = vadd.f32 %v1200_v18, %v638_v17  ;;  %v518_v29 = vld [vmem:[%s2482_s12 + $0x950] sm:$0xff]  ;;  %v403_v30 = vld [vmem:[%s2482_s12 + $0x5b8] sm:$0xff]  ;;  %v633_v32 = vld [vmem:[%s2482_s12 + $0xce8] sm:$0xff] }
  0xb3   : > { %v934_v31 = vadd.f32 %v933_v20, %v401_v15  ;;  %v640_v33 = vld [vmem:[%s2482_s12 + $0xd20] sm:$0xff]  ;;  %v1065_v34 = vadd.f32 %v517_v28, %v516_v27  ;;  %v634_v36 = vld [vmem:[%s2482_s12 + $0xcf0] sm:$0xff]  ;;  %v519_v39 = vld [vmem:[%s2482_s12 + $0x958] sm:$0xff] }
  0xb4   : > { %1063 = vadd.xlane.f32.xlu1 %v1062_v23  ;;  %v927_v35 = vadd.f32 %v926_v24, %v395_v13  ;;  %v1194_v37 = vadd.f32 %v1193_v25, %v632_v21  ;;  %v1202_v38 = vadd.f32 %v1201_v26, %v639_v22  ;;  %v524_v40 = vld [vmem:[%s2482_s12 + $0x980] sm:$0xff]  ;;  %v641_v42 = vld [vmem:[%s2482_s12 + $0xd28] sm:$0xff]  ;;  %v526_v45 = vld [vmem:[%s2482_s12 + $0x990] sm:$0xff] }
  0xb5   : > { %v935_v41 = vadd.f32 %v934_v31, %v402_v19  ;;  %v1066_v43 = vadd.f32 %v1065_v34, %v518_v29  ;;  %v525_v44 = vld [vmem:[%s2482_s12 + $0x988] sm:$0xff]  ;;  %v635_v46 = vld [vmem:[%s2482_s12 + $0xcf8] sm:$0xff]  ;;  %v642_v48 = vld [vmem:[%s2482_s12 + $0xd30] sm:$0xff] }
  0xb6   : > { %928 = vadd.xlane.f32.xlu0 %v927_v35  ;;  %v1195_v47 = vadd.f32 %v1194_v37, %v633_v32  ;;  %v1203_v49 = vadd.f32 %v1202_v38, %v640_v33  ;;  %v520_v50 = vld [vmem:[%s2482_s12 + $0x960] sm:$0xff]  ;;  %v1074_v51 = vadd.f32 %v525_v44, %v524_v40  ;;  %v527_v54 = vld [vmem:[%s2482_s12 + $0x998] sm:$0xff]  ;;  %v405_v56 = vld [vmem:[%s2482_s12 + $0x5c8] sm:$0xff] }
  0xb7   : > { %v936_v52 = vadd.f32 %v935_v41, %v403_v30  ;;  %v1067_v53 = vadd.f32 %v1066_v43, %v519_v39  ;;  %v404_v55 = vld [vmem:[%s2482_s12 + $0x5c0] sm:$0xff]  ;;  %v643_v58 = vld [vmem:[%s2482_s12 + $0xd38] sm:$0xff]  ;;  %v521_v60 = vld [vmem:[%s2482_s12 + $0x968] sm:$0xff] }
  0xb8   : > { %v1196_v57 = vadd.f32 %v1195_v47, %v634_v36  ;;  %v1204_v59 = vadd.f32 %v1203_v49, %v641_v42  ;;  %v1075_v61 = vadd.f32 %v1074_v51, %v526_v45  ;;  %v406_v62 = vld [vmem:[%s2482_s12 + $0x5d0] sm:$0xff]  ;;  %v939_v63 = vadd.f32 %v405_v56, %v404_v55  ;;  %v528_v2 = vld [vmem:[%s2482_s12 + $0x9a0] sm:$0xff]  ;;  %v407_v3 = vld [vmem:[%s2482_s12 + $0x5d8] sm:$0xff] }
  0xb9   : > { %937 = vadd.xlane.f32.xlu1 %v936_v52  ;;  %v522_v0 = vld [vmem:[%s2482_s12 + $0x970] sm:$0xff]  ;;  %v1068_v1 = vadd.f32 %v1067_v53, %v520_v50  ;;  %v412_v8 = vld [vmem:[%s2482_s12 + $0x600] sm:$0xff]  ;;  %v413_v9 = vld [vmem:[%s2482_s12 + $0x608] sm:$0xff] }
  0xba   : > { %v1197_v4 = vadd.f32 %v1196_v57, %v635_v46  ;;  %v1205_v5 = vadd.f32 %v1204_v59, %v642_v48  ;;  %v1076_v6 = vadd.f32 %v1075_v61, %v527_v54  ;;  %v940_v7 = vadd.f32 %v939_v63, %v406_v62  ;;  %v414_v10 = vld [vmem:[%s2482_s12 + $0x610] sm:$0xff]  ;;  %v523_v11 = vld [vmem:[%s2482_s12 + $0x978] sm:$0xff]  ;;  %v529_v13 = vld [vmem:[%s2482_s12 + $0x9a8] sm:$0xff] }
  0xbb   : > { %v1069_v12 = vadd.f32 %v1068_v1, %v521_v60  ;;  %v408_v14 = vld [vmem:[%s2482_s12 + $0x5e0] sm:$0xff]  ;;  %v948_v15 = vadd.f32 %v413_v9, %v412_v8  ;;  %v530_v17 = vld [vmem:[%s2482_s12 + $0x9b0] sm:$0xff]  ;;  %v415_v20 = vld [vmem:[%s2482_s12 + $0x618] sm:$0xff] }
  0xbc   : > { %1198 = vadd.xlane.f32.xlu0 %v1197_v4  ;;  %v1206_v16 = vadd.f32 %v1205_v5, %v643_v58  ;;  %v1077_v18 = vadd.f32 %v1076_v6, %v528_v2  ;;  %v941_v19 = vadd.f32 %v940_v7, %v407_v3  ;;  %v644_v21 = vld [vmem:[%s2482_s12 + $0xd40] sm:$0xff]  ;;  %v409_v23 = vld [vmem:[%s2482_s12 + $0x5e8] sm:$0xff]  ;;  %v646_v26 = vld [vmem:[%s2482_s12 + $0xd50] sm:$0xff] }
  0xbd   : > { %v1070_v22 = vadd.f32 %v1069_v12, %v522_v0  ;;  %v949_v24 = vadd.f32 %v948_v15, %v414_v10  ;;  %v645_v25 = vld [vmem:[%s2482_s12 + $0xd48] sm:$0xff]  ;;  %v531_v27 = vld [vmem:[%s2482_s12 + $0x9b8] sm:$0xff]  ;;  %v410_v29 = vld [vmem:[%s2482_s12 + $0x5f0] sm:$0xff] }
  0xbe   : > { %1207 = vadd.xlane.f32.xlu1 %v1206_v16  ;;  %v1078_v28 = vadd.f32 %v1077_v18, %v529_v13  ;;  %v942_v30 = vadd.f32 %v941_v19, %v408_v14  ;;  %v416_v31 = vld [vmem:[%s2482_s12 + $0x620] sm:$0xff]  ;;  %v1209_v32 = vadd.f32 %v645_v25, %v644_v21  ;;  %v647_v35 = vld [vmem:[%s2482_s12 + $0xd58] sm:$0xff]  ;;  %v653_v37 = vld [vmem:[%s2482_s12 + $0xd88] sm:$0xff] }
  0xbf   : > { %v1071_v33 = vadd.f32 %v1070_v22, %v523_v11  ;;  %v950_v34 = vadd.f32 %v949_v24, %v415_v20  ;;  %v652_v36 = vld [vmem:[%s2482_s12 + $0xd80] sm:$0xff]  ;;  %v411_v39 = vld [vmem:[%s2482_s12 + $0x5f8] sm:$0xff]  ;;  %v417_v41 = vld [vmem:[%s2482_s12 + $0x628] sm:$0xff] }
  0xc0   : > { %v1079_v38 = vadd.f32 %v1078_v28, %v530_v17  ;;  %v943_v40 = vadd.f32 %v942_v30, %v409_v23  ;;  %v1210_v42 = vadd.f32 %v1209_v32, %v646_v26  ;;  %v654_v43 = vld [vmem:[%s2482_s12 + $0xd90] sm:$0xff]  ;;  %v1218_v44 = vadd.f32 %v653_v37, %v652_v36  ;;  %v648_v47 = vld [vmem:[%s2482_s12 + $0xd60] sm:$0xff]  ;;  %v655_v48 = vld [vmem:[%s2482_s12 + $0xd98] sm:$0xff] }
  0xc1   : > { %1072 = vadd.xlane.f32.xlu0 %v1071_v33  ;;  %v418_v45 = vld [vmem:[%s2482_s12 + $0x630] sm:$0xff]  ;;  %v951_v46 = vadd.f32 %v950_v34, %v416_v31  ;;  %v532_v53 = vld [vmem:[%s2482_s12 + $0x9c0] sm:$0xff]  ;;  %v533_v54 = vld [vmem:[%s2482_s12 + $0x9c8] sm:$0xff] }
  0xc2   : > { %v1080_v49 = vadd.f32 %v1079_v38, %v531_v27  ;;  %v944_v50 = vadd.f32 %v943_v40, %v410_v29  ;;  %v1211_v51 = vadd.f32 %v1210_v42, %v647_v35  ;;  %v1219_v52 = vadd.f32 %v1218_v44, %v654_v43  ;;  %v534_v55 = vld [vmem:[%s2482_s12 + $0x9d0] sm:$0xff]  ;;  %v419_v56 = vld [vmem:[%s2482_s12 + $0x638] sm:$0xff]  ;;  %v649_v58 = vld [vmem:[%s2482_s12 + $0xd68] sm:$0xff] }
  0xc3   : > { %v952_v57 = vadd.f32 %v951_v46, %v417_v41  ;;  %v656_v59 = vld [vmem:[%s2482_s12 + $0xda0] sm:$0xff]  ;;  %v1083_v60 = vadd.f32 %v533_v54, %v532_v53  ;;  %v650_v62 = vld [vmem:[%s2482_s12 + $0xd70] sm:$0xff]  ;;  %v535_v1 = vld [vmem:[%s2482_s12 + $0x9d8] sm:$0xff] }
  0xc4   : > { %1081 = vadd.xlane.f32.xlu1 %v1080_v49  ;;  %v945_v61 = vadd.f32 %v944_v50, %v411_v39  ;;  %v1212_v63 = vadd.f32 %v1211_v51, %v648_v47  ;;  %v1220_v0 = vadd.f32 %v1219_v52, %v655_v48  ;;  %v540_v2 = vld [vmem:[%s2482_s12 + $0xa00] sm:$0xff]  ;;  %v657_v4 = vld [vmem:[%s2482_s12 + $0xda8] sm:$0xff]  ;;  %v542_v7 = vld [vmem:[%s2482_s12 + $0xa10] sm:$0xff] }
  0xc5   : > { %v953_v3 = vadd.f32 %v952_v57, %v418_v45  ;;  %v1084_v5 = vadd.f32 %v1083_v60, %v534_v55  ;;  %v541_v6 = vld [vmem:[%s2482_s12 + $0xa08] sm:$0xff]  ;;  %v651_v8 = vld [vmem:[%s2482_s12 + $0xd78] sm:$0xff]  ;;  %v658_v10 = vld [vmem:[%s2482_s12 + $0xdb0] sm:$0xff] }
  0xc6   : > { %946 = vadd.xlane.f32.xlu0 %v945_v61  ;;  %v1213_v9 = vadd.f32 %v1212_v63, %v649_v58  ;;  %v1221_v11 = vadd.f32 %v1220_v0, %v656_v59  ;;  %v536_v12 = vld [vmem:[%s2482_s12 + $0x9e0] sm:$0xff]  ;;  %v1092_v13 = vadd.f32 %v541_v6, %v540_v2  ;;  %v543_v16 = vld [vmem:[%s2482_s12 + $0xa18] sm:$0xff]  ;;  %v421_v18 = vld [vmem:[%s2482_s12 + $0x648] sm:$0xff] }
  0xc7   : > { %v954_v14 = vadd.f32 %v953_v3, %v419_v56  ;;  %v1085_v15 = vadd.f32 %v1084_v5, %v535_v1  ;;  %v420_v17 = vld [vmem:[%s2482_s12 + $0x640] sm:$0xff]  ;;  %v659_v20 = vld [vmem:[%s2482_s12 + $0xdb8] sm:$0xff]  ;;  %v537_v22 = vld [vmem:[%s2482_s12 + $0x9e8] sm:$0xff] }
  0xc8   : > { %v1214_v19 = vadd.f32 %v1213_v9, %v650_v62  ;;  %v1222_v21 = vadd.f32 %v1221_v11, %v657_v4  ;;  %v1093_v23 = vadd.f32 %v1092_v13, %v542_v7  ;;  %v422_v24 = vld [vmem:[%s2482_s12 + $0x650] sm:$0xff]  ;;  %v957_v25 = vadd.f32 %v421_v18, %v420_v17  ;;  %v544_v28 = vld [vmem:[%s2482_s12 + $0xa20] sm:$0xff]  ;;  %v423_v29 = vld [vmem:[%s2482_s12 + $0x658] sm:$0xff] }
  0xc9   : > { %955 = vadd.xlane.f32.xlu1 %v954_v14  ;;  %v538_v26 = vld [vmem:[%s2482_s12 + $0x9f0] sm:$0xff]  ;;  %v1086_v27 = vadd.f32 %v1085_v15, %v536_v12  ;;  %v428_v34 = vld [vmem:[%s2482_s12 + $0x680] sm:$0xff]  ;;  %v429_v35 = vld [vmem:[%s2482_s12 + $0x688] sm:$0xff] }
  0xca   : > { %v1215_v30 = vadd.f32 %v1214_v19, %v651_v8  ;;  %v1223_v31 = vadd.f32 %v1222_v21, %v658_v10  ;;  %v1094_v32 = vadd.f32 %v1093_v23, %v543_v16  ;;  %v958_v33 = vadd.f32 %v957_v25, %v422_v24  ;;  %v430_v36 = vld [vmem:[%s2482_s12 + $0x690] sm:$0xff]  ;;  %v539_v37 = vld [vmem:[%s2482_s12 + $0x9f8] sm:$0xff]  ;;  %v545_v39 = vld [vmem:[%s2482_s12 + $0xa28] sm:$0xff] }
  0xcb   : > { %v1087_v38 = vadd.f32 %v1086_v27, %v537_v22  ;;  %v424_v40 = vld [vmem:[%s2482_s12 + $0x660] sm:$0xff]  ;;  %v966_v41 = vadd.f32 %v429_v35, %v428_v34  ;;  %v546_v43 = vld [vmem:[%s2482_s12 + $0xa30] sm:$0xff]  ;;  %v431_v46 = vld [vmem:[%s2482_s12 + $0x698] sm:$0xff] }
  0xcc   : > { %1216 = vadd.xlane.f32.xlu0 %v1215_v30  ;;  %v1224_v42 = vadd.f32 %v1223_v31, %v659_v20  ;;  %v1095_v44 = vadd.f32 %v1094_v32, %v544_v28  ;;  %v959_v45 = vadd.f32 %v958_v33, %v423_v29  ;;  %v660_v47 = vld [vmem:[%s2482_s12 + $0xdc0] sm:$0xff]  ;;  %v425_v49 = vld [vmem:[%s2482_s12 + $0x668] sm:$0xff]  ;;  %v662_v52 = vld [vmem:[%s2482_s12 + $0xdd0] sm:$0xff] }
  0xcd   : > { %v1088_v48 = vadd.f32 %v1087_v38, %v538_v26  ;;  %v967_v50 = vadd.f32 %v966_v41, %v430_v36  ;;  %v661_v51 = vld [vmem:[%s2482_s12 + $0xdc8] sm:$0xff]  ;;  %v547_v53 = vld [vmem:[%s2482_s12 + $0xa38] sm:$0xff]  ;;  %v426_v55 = vld [vmem:[%s2482_s12 + $0x670] sm:$0xff] }
  0xce   : > { %1225 = vadd.xlane.f32.xlu1 %v1224_v42  ;;  %v1096_v54 = vadd.f32 %v1095_v44, %v545_v39  ;;  %v960_v56 = vadd.f32 %v959_v45, %v424_v40  ;;  %v432_v57 = vld [vmem:[%s2482_s12 + $0x6a0] sm:$0xff]  ;;  %v1227_v58 = vadd.f32 %v661_v51, %v660_v47  ;;  %v663_v61 = vld [vmem:[%s2482_s12 + $0xdd8] sm:$0xff]  ;;  %v669_v63 = vld [vmem:[%s2482_s12 + $0xe08] sm:$0xff] }
  0xcf   : > { %v1089_v59 = vadd.f32 %v1088_v48, %v539_v37  ;;  %v968_v60 = vadd.f32 %v967_v50, %v431_v46  ;;  %v668_v62 = vld [vmem:[%s2482_s12 + $0xe00] sm:$0xff]  ;;  %v427_v1 = vld [vmem:[%s2482_s12 + $0x678] sm:$0xff]  ;;  %v433_v3 = vld [vmem:[%s2482_s12 + $0x6a8] sm:$0xff] }
  0xd0   : > { %v1097_v0 = vadd.f32 %v1096_v54, %v546_v43  ;;  %v961_v2 = vadd.f32 %v960_v56, %v425_v49  ;;  %v1228_v4 = vadd.f32 %v1227_v58, %v662_v52  ;;  %v670_v5 = vld [vmem:[%s2482_s12 + $0xe10] sm:$0xff]  ;;  %v1236_v6 = vadd.f32 %v669_v63, %v668_v62  ;;  %v664_v9 = vld [vmem:[%s2482_s12 + $0xde0] sm:$0xff]  ;;  %v671_v10 = vld [vmem:[%s2482_s12 + $0xe18] sm:$0xff] }
  0xd1   : > { %1090 = vadd.xlane.f32.xlu0 %v1089_v59  ;;  %v434_v7 = vld [vmem:[%s2482_s12 + $0x6b0] sm:$0xff]  ;;  %v969_v8 = vadd.f32 %v968_v60, %v432_v57  ;;  %v548_v15 = vld [vmem:[%s2482_s12 + $0xa40] sm:$0xff]  ;;  %v549_v16 = vld [vmem:[%s2482_s12 + $0xa48] sm:$0xff] }
  0xd2   : > { %v1098_v11 = vadd.f32 %v1097_v0, %v547_v53  ;;  %v962_v12 = vadd.f32 %v961_v2, %v426_v55  ;;  %v1229_v13 = vadd.f32 %v1228_v4, %v663_v61  ;;  %v1237_v14 = vadd.f32 %v1236_v6, %v670_v5  ;;  %v550_v17 = vld [vmem:[%s2482_s12 + $0xa50] sm:$0xff]  ;;  %v435_v18 = vld [vmem:[%s2482_s12 + $0x6b8] sm:$0xff]  ;;  %v665_v20 = vld [vmem:[%s2482_s12 + $0xde8] sm:$0xff] }
  0xd3   : > { %v970_v19 = vadd.f32 %v969_v8, %v433_v3  ;;  %v672_v21 = vld [vmem:[%s2482_s12 + $0xe20] sm:$0xff]  ;;  %v1101_v22 = vadd.f32 %v549_v16, %v548_v15  ;;  %v666_v24 = vld [vmem:[%s2482_s12 + $0xdf0] sm:$0xff]  ;;  %v551_v27 = vld [vmem:[%s2482_s12 + $0xa58] sm:$0xff] }
  0xd4   : > { %1099 = vadd.xlane.f32.xlu1 %v1098_v11  ;;  %v963_v23 = vadd.f32 %v962_v12, %v427_v1  ;;  %v1230_v25 = vadd.f32 %v1229_v13, %v664_v9  ;;  %v1238_v26 = vadd.f32 %v1237_v14, %v671_v10  ;;  %v556_v28 = vld [vmem:[%s2482_s12 + $0xa80] sm:$0xff]  ;;  %v673_v30 = vld [vmem:[%s2482_s12 + $0xe28] sm:$0xff]  ;;  %v558_v33 = vld [vmem:[%s2482_s12 + $0xa90] sm:$0xff] }
  0xd5   : > { %v971_v29 = vadd.f32 %v970_v19, %v434_v7  ;;  %v1102_v31 = vadd.f32 %v1101_v22, %v550_v17  ;;  %v557_v32 = vld [vmem:[%s2482_s12 + $0xa88] sm:$0xff]  ;;  %v667_v34 = vld [vmem:[%s2482_s12 + $0xdf8] sm:$0xff]  ;;  %v674_v36 = vld [vmem:[%s2482_s12 + $0xe30] sm:$0xff] }
  0xd6   : > { %964 = vadd.xlane.f32.xlu0 %v963_v23  ;;  %v1231_v35 = vadd.f32 %v1230_v25, %v665_v20  ;;  %v1239_v37 = vadd.f32 %v1238_v26, %v672_v21  ;;  %v552_v38 = vld [vmem:[%s2482_s12 + $0xa60] sm:$0xff]  ;;  %v1110_v39 = vadd.f32 %v557_v32, %v556_v28  ;;  %v559_v42 = vld [vmem:[%s2482_s12 + $0xa98] sm:$0xff]  ;;  %v437_v44 = vld [vmem:[%s2482_s12 + $0x6c8] sm:$0xff] }
  0xd7   : > { %v972_v40 = vadd.f32 %v971_v29, %v435_v18  ;;  %v1103_v41 = vadd.f32 %v1102_v31, %v551_v27  ;;  %v436_v43 = vld [vmem:[%s2482_s12 + $0x6c0] sm:$0xff]  ;;  %v675_v46 = vld [vmem:[%s2482_s12 + $0xe38] sm:$0xff]  ;;  %v553_v48 = vld [vmem:[%s2482_s12 + $0xa68] sm:$0xff] }
  0xd8   : > { %v1232_v45 = vadd.f32 %v1231_v35, %v666_v24  ;;  %v1240_v47 = vadd.f32 %v1239_v37, %v673_v30  ;;  %v1111_v49 = vadd.f32 %v1110_v39, %v558_v33  ;;  %v438_v50 = vld [vmem:[%s2482_s12 + $0x6d0] sm:$0xff]  ;;  %v975_v51 = vadd.f32 %v437_v44, %v436_v43  ;;  %v560_v54 = vld [vmem:[%s2482_s12 + $0xaa0] sm:$0xff]  ;;  %v439_v55 = vld [vmem:[%s2482_s12 + $0x6d8] sm:$0xff] }
  0xd9   : > { %973 = vadd.xlane.f32.xlu1 %v972_v40  ;;  %v554_v52 = vld [vmem:[%s2482_s12 + $0xa70] sm:$0xff]  ;;  %v1104_v53 = vadd.f32 %v1103_v41, %v552_v38  ;;  %v444_v60 = vld [vmem:[%s2482_s12 + $0x700] sm:$0xff]  ;;  %v445_v61 = vld [vmem:[%s2482_s12 + $0x708] sm:$0xff] }
  0xda   : > { %v1233_v56 = vadd.f32 %v1232_v45, %v667_v34  ;;  %v1241_v57 = vadd.f32 %v1240_v47, %v674_v36  ;;  %v1112_v58 = vadd.f32 %v1111_v49, %v559_v42  ;;  %v976_v59 = vadd.f32 %v975_v51, %v438_v50  ;;  %v446_v62 = vld [vmem:[%s2482_s12 + $0x710] sm:$0xff]  ;;  %v555_v63 = vld [vmem:[%s2482_s12 + $0xa78] sm:$0xff]  ;;  %v561_v1 = vld [vmem:[%s2482_s12 + $0xaa8] sm:$0xff] }
  0xdb   : > { %v1105_v0 = vadd.f32 %v1104_v53, %v553_v48  ;;  %v440_v2 = vld [vmem:[%s2482_s12 + $0x6e0] sm:$0xff]  ;;  %v984_v3 = vadd.f32 %v445_v61, %v444_v60  ;;  %v562_v5 = vld [vmem:[%s2482_s12 + $0xab0] sm:$0xff]  ;;  %v447_v8 = vld [vmem:[%s2482_s12 + $0x718] sm:$0xff] }
  0xdc   : > { %1234 = vadd.xlane.f32.xlu0 %v1233_v56  ;;  %v1242_v4 = vadd.f32 %v1241_v57, %v675_v46  ;;  %v1113_v6 = vadd.f32 %v1112_v58, %v560_v54  ;;  %v977_v7 = vadd.f32 %v976_v59, %v439_v55  ;;  %v676_v9 = vld [vmem:[%s2482_s12 + $0xe40] sm:$0xff]  ;;  %v441_v11 = vld [vmem:[%s2482_s12 + $0x6e8] sm:$0xff]  ;;  %v678_v14 = vld [vmem:[%s2482_s12 + $0xe50] sm:$0xff] }
  0xdd   : > { %v1106_v10 = vadd.f32 %v1105_v0, %v554_v52  ;;  %v985_v12 = vadd.f32 %v984_v3, %v446_v62  ;;  %v677_v13 = vld [vmem:[%s2482_s12 + $0xe48] sm:$0xff]  ;;  %v563_v15 = vld [vmem:[%s2482_s12 + $0xab8] sm:$0xff]  ;;  %v442_v17 = vld [vmem:[%s2482_s12 + $0x6f0] sm:$0xff] }
  0xde   : > { %1243 = vadd.xlane.f32.xlu1 %v1242_v4  ;;  %v1114_v16 = vadd.f32 %v1113_v6, %v561_v1  ;;  %v978_v18 = vadd.f32 %v977_v7, %v440_v2  ;;  %v448_v19 = vld [vmem:[%s2482_s12 + $0x720] sm:$0xff]  ;;  %v1245_v20 = vadd.f32 %v677_v13, %v676_v9  ;;  %v679_v23 = vld [vmem:[%s2482_s12 + $0xe58] sm:$0xff]  ;;  %v685_v25 = vld [vmem:[%s2482_s12 + $0xe88] sm:$0xff] }
  0xdf   : > { %v1107_v21 = vadd.f32 %v1106_v10, %v555_v63  ;;  %v986_v22 = vadd.f32 %v985_v12, %v447_v8  ;;  %v684_v24 = vld [vmem:[%s2482_s12 + $0xe80] sm:$0xff]  ;;  %v443_v27 = vld [vmem:[%s2482_s12 + $0x6f8] sm:$0xff]  ;;  %v449_v29 = vld [vmem:[%s2482_s12 + $0x728] sm:$0xff] }
  0xe0   : > { %v1115_v26 = vadd.f32 %v1114_v16, %v562_v5  ;;  %v979_v28 = vadd.f32 %v978_v18, %v441_v11  ;;  %v1246_v30 = vadd.f32 %v1245_v20, %v678_v14  ;;  %v686_v31 = vld [vmem:[%s2482_s12 + $0xe90] sm:$0xff]  ;;  %v1254_v32 = vadd.f32 %v685_v25, %v684_v24  ;;  %v680_v35 = vld [vmem:[%s2482_s12 + $0xe60] sm:$0xff]  ;;  %v687_v36 = vld [vmem:[%s2482_s12 + $0xe98] sm:$0xff] }
  0xe1   : > { %1108 = vadd.xlane.f32.xlu0 %v1107_v21  ;;  %v450_v33 = vld [vmem:[%s2482_s12 + $0x730] sm:$0xff]  ;;  %v987_v34 = vadd.f32 %v986_v22, %v448_v19  ;;  %v564_v41 = vld [vmem:[%s2482_s12 + $0xac0] sm:$0xff]  ;;  %v565_v42 = vld [vmem:[%s2482_s12 + $0xac8] sm:$0xff] }
  0xe2   : > { %v1116_v37 = vadd.f32 %v1115_v26, %v563_v15  ;;  %v980_v38 = vadd.f32 %v979_v28, %v442_v17  ;;  %v1247_v39 = vadd.f32 %v1246_v30, %v679_v23  ;;  %v1255_v40 = vadd.f32 %v1254_v32, %v686_v31  ;;  %v566_v43 = vld [vmem:[%s2482_s12 + $0xad0] sm:$0xff]  ;;  %v451_v44 = vld [vmem:[%s2482_s12 + $0x738] sm:$0xff]  ;;  %v681_v46 = vld [vmem:[%s2482_s12 + $0xe68] sm:$0xff] }
  0xe3   : > { %v988_v45 = vadd.f32 %v987_v34, %v449_v29  ;;  %v688_v47 = vld [vmem:[%s2482_s12 + $0xea0] sm:$0xff]  ;;  %v1119_v48 = vadd.f32 %v565_v42, %v564_v41  ;;  %v682_v50 = vld [vmem:[%s2482_s12 + $0xe70] sm:$0xff]  ;;  %v567_v53 = vld [vmem:[%s2482_s12 + $0xad8] sm:$0xff]  ;;  %v1372_v30 = vlaneseq }
  0xe4   : > { %1117 = vadd.xlane.f32.xlu1 %v1116_v37  ;;  %v981_v49 = vadd.f32 %v980_v38, %v443_v27  ;;  %v1248_v51 = vadd.f32 %v1247_v39, %v680_v35  ;;  %v1256_v52 = vadd.f32 %v1255_v40, %v687_v36  ;;  %v572_v54 = vld [vmem:[%s2482_s12 + $0xb00] sm:$0xff]  ;;  %v689_v56 = vld [vmem:[%s2482_s12 + $0xea8] sm:$0xff]  ;;  %v574_v59 = vld [vmem:[%s2482_s12 + $0xb10] sm:$0xff] }
  0xe5   : > { %v989_v55 = vadd.f32 %v988_v45, %v450_v33  ;;  %v1120_v57 = vadd.f32 %v1119_v48, %v566_v43  ;;  %v573_v58 = vld [vmem:[%s2482_s12 + $0xb08] sm:$0xff]  ;;  %v683_v60 = vld [vmem:[%s2482_s12 + $0xe78] sm:$0xff]  ;;  %v690_v62 = vld [vmem:[%s2482_s12 + $0xeb0] sm:$0xff] }
  0xe6   : > { %982 = vadd.xlane.f32.xlu0 %v981_v49  ;;  %v1249_v61 = vadd.f32 %v1248_v51, %v681_v46  ;;  %v1257_v63 = vadd.f32 %v1256_v52, %v688_v47  ;;  %v568_v0 = vld [vmem:[%s2482_s12 + $0xae0] sm:$0xff]  ;;  %v1128_v1 = vadd.f32 %v573_v58, %v572_v54  ;;  %v575_v4 = vld [vmem:[%s2482_s12 + $0xb18] sm:$0xff]  ;;  %v453_v6 = vld [vmem:[%s2482_s12 + $0x748] sm:$0xff] }
  0xe7   : > { %v990_v2 = vadd.f32 %v989_v55, %v451_v44  ;;  %v1121_v3 = vadd.f32 %v1120_v57, %v567_v53  ;;  %v452_v5 = vld [vmem:[%s2482_s12 + $0x740] sm:$0xff]  ;;  %v691_v8 = vld [vmem:[%s2482_s12 + $0xeb8] sm:$0xff]  ;;  %v569_v10 = vld [vmem:[%s2482_s12 + $0xae8] sm:$0xff]  ;;  %v2935_v53 = vand.u32 127, %v1372_v30 }
  0xe8   : > { %v1250_v7 = vadd.f32 %v1249_v61, %v682_v50  ;;  %v1258_v9 = vadd.f32 %v1257_v63, %v689_v56  ;;  %v1129_v11 = vadd.f32 %v1128_v1, %v574_v59  ;;  %v454_v12 = vld [vmem:[%s2482_s12 + $0x750] sm:$0xff]  ;;  %v993_v13 = vadd.f32 %v453_v6, %v452_v5  ;;  %v576_v16 = vld [vmem:[%s2482_s12 + $0xb20] sm:$0xff]  ;;  %v455_v17 = vld [vmem:[%s2482_s12 + $0x758] sm:$0xff] }
  0xe9   : > { %991 = vadd.xlane.f32.xlu1 %v990_v2  ;;  %v570_v14 = vld [vmem:[%s2482_s12 + $0xaf0] sm:$0xff]  ;;  %v1122_v15 = vadd.f32 %v1121_v3, %v568_v0  ;;  %v460_v22 = vld [vmem:[%s2482_s12 + $0x780] sm:$0xff]  ;;  %v461_v23 = vld [vmem:[%s2482_s12 + $0x788] sm:$0xff]  ;;  %v2943_v1 = vshrl.u32 %v1372_v30, 7 }
  0xea   : > { %v1251_v18 = vadd.f32 %v1250_v7, %v683_v60  ;;  %v1259_v19 = vadd.f32 %v1258_v9, %v690_v62  ;;  %v1130_v20 = vadd.f32 %v1129_v11, %v575_v4  ;;  %v994_v21 = vadd.f32 %v993_v13, %v454_v12  ;;  %v462_v24 = vld [vmem:[%s2482_s12 + $0x790] sm:$0xff]  ;;  %v571_v25 = vld [vmem:[%s2482_s12 + $0xaf8] sm:$0xff]  ;;  %v577_v27 = vld [vmem:[%s2482_s12 + $0xb28] sm:$0xff] }
  0xeb   : > { %v1123_v26 = vadd.f32 %v1122_v15, %v569_v10  ;;  %v456_v28 = vld [vmem:[%s2482_s12 + $0x760] sm:$0xff]  ;;  %v1002_v29 = vadd.f32 %v461_v23, %v460_v22  ;;  %v578_v32 = vld [vmem:[%s2482_s12 + $0xb30] sm:$0xff]  ;;  %v463_v35 = vld [vmem:[%s2482_s12 + $0x798] sm:$0xff] }
  0xec   : > { %1252 = vadd.xlane.f32.xlu0 %v1251_v18  ;;  %v1260_v31 = vadd.f32 %v1259_v19, %v691_v8  ;;  %v1131_v33 = vadd.f32 %v1130_v20, %v576_v16  ;;  %v995_v34 = vadd.f32 %v994_v21, %v455_v17  ;;  %v692_v36 = vld [vmem:[%s2482_s12 + $0xec0] sm:$0xff]  ;;  %v457_v38 = vld [vmem:[%s2482_s12 + $0x768] sm:$0xff]  ;;  %v694_v41 = vld [vmem:[%s2482_s12 + $0xed0] sm:$0xff]  ;;  %v1385_v20 = vadd.s32 4294967280, %v2935_v53 }
  0xed   : > { %v1124_v37 = vadd.f32 %v1123_v26, %v570_v14  ;;  %v1003_v39 = vadd.f32 %v1002_v29, %v462_v24  ;;  %v693_v40 = vld [vmem:[%s2482_s12 + $0xec8] sm:$0xff]  ;;  %v579_v42 = vld [vmem:[%s2482_s12 + $0xb38] sm:$0xff]  ;;  %v458_v44 = vld [vmem:[%s2482_s12 + $0x770] sm:$0xff]  ;;  %v2960_v26 = vsub.s32 %v2935_v53, %v2943_v1 }
  0xee   : > { %1261 = vadd.xlane.f32.xlu1 %v1260_v31  ;;  %v1132_v43 = vadd.f32 %v1131_v33, %v577_v27  ;;  %v996_v45 = vadd.f32 %v995_v34, %v456_v28  ;;  %v464_v46 = vld [vmem:[%s2482_s12 + $0x7a0] sm:$0xff]  ;;  %v1263_v47 = vadd.f32 %v693_v40, %v692_v36  ;;  %v695_v50 = vld [vmem:[%s2482_s12 + $0xed8] sm:$0xff]  ;;  %v701_v52 = vld [vmem:[%s2482_s12 + $0xf08] sm:$0xff]  ;;  %v1392_v27 = vadd.s32 4294967272, %v2935_v53 }
  0xef   : > { %v1125_v48 = vadd.f32 %v1124_v37, %v571_v25  ;;  %v1004_v49 = vadd.f32 %v1003_v39, %v463_v35  ;;  %v700_v51 = vld [vmem:[%s2482_s12 + $0xf00] sm:$0xff]  ;;  %v459_v55 = vld [vmem:[%s2482_s12 + $0x778] sm:$0xff]  ;;  %v465_v57 = vld [vmem:[%s2482_s12 + $0x7a8] sm:$0xff]  ;;  %v1378_v35 = vadd.s32 4294967288, %v2935_v53 }
  0xf0   : > { %v1133_v54 = vadd.f32 %v1132_v43, %v578_v32  ;;  %v997_v56 = vadd.f32 %v996_v45, %v457_v38  ;;  %v1264_v58 = vadd.f32 %v1263_v47, %v694_v41  ;;  %v702_v59 = vld [vmem:[%s2482_s12 + $0xf10] sm:$0xff]  ;;  %v1272_v60 = vadd.f32 %v701_v52, %v700_v51  ;;  %v696_v63 = vld [vmem:[%s2482_s12 + $0xee0] sm:$0xff]  ;;  %v703_v0 = vld [vmem:[%s2482_s12 + $0xf18] sm:$0xff] }
  0xf1   : > { %1126 = vadd.xlane.f32.xlu0 %v1125_v48  ;;  %v466_v61 = vld [vmem:[%s2482_s12 + $0x7b0] sm:$0xff]  ;;  %v1005_v62 = vadd.f32 %v1004_v49, %v464_v46  ;;  %v580_v6 = vld [vmem:[%s2482_s12 + $0xb40] sm:$0xff]  ;;  %v581_v7 = vld [vmem:[%s2482_s12 + $0xb48] sm:$0xff]  ;;  %v1406_v41 = vadd.s32 4294967256, %v2935_v53 }
  0xf2   : > { %v1134_v2 = vadd.f32 %v1133_v54, %v579_v42  ;;  %v998_v3 = vadd.f32 %v997_v56, %v458_v44  ;;  %v1265_v4 = vadd.f32 %v1264_v58, %v695_v50  ;;  %v1273_v5 = vadd.f32 %v1272_v60, %v702_v59  ;;  %v582_v8 = vld [vmem:[%s2482_s12 + $0xb50] sm:$0xff]  ;;  %v467_v9 = vld [vmem:[%s2482_s12 + $0x7b8] sm:$0xff]  ;;  %v697_v11 = vld [vmem:[%s2482_s12 + $0xee8] sm:$0xff] }
  0xf3   : > { %v1006_v10 = vadd.f32 %v1005_v62, %v465_v57  ;;  %v704_v12 = vld [vmem:[%s2482_s12 + $0xf20] sm:$0xff]  ;;  %v1137_v13 = vadd.f32 %v581_v7, %v580_v6  ;;  %v698_v15 = vld [vmem:[%s2482_s12 + $0xef0] sm:$0xff]  ;;  %v583_v18 = vld [vmem:[%s2482_s12 + $0xb58] sm:$0xff]  ;;  %v1399_v42 = vadd.s32 4294967264, %v2935_v53  ;;  %v2986_v57 = vsub.s32 %v1392_v27, %v2943_v1 }
  0xf4   : > { %1135 = vadd.xlane.f32.xlu1 %v1134_v2  ;;  %v999_v14 = vadd.f32 %v998_v3, %v459_v55  ;;  %v1266_v16 = vadd.f32 %v1265_v4, %v696_v63  ;;  %v1274_v17 = vadd.f32 %v1273_v5, %v703_v0  ;;  %v588_v19 = vld [vmem:[%s2482_s12 + $0xb80] sm:$0xff]  ;;  %v705_v22 = vld [vmem:[%s2482_s12 + $0xf28] sm:$0xff]  ;;  %v590_v25 = vld [vmem:[%s2482_s12 + $0xb90] sm:$0xff]  ;;  %v2981_v55 = vsub.s32 %v1385_v20, %v2943_v1 }
  0xf5   : > { %v1007_v21 = vadd.f32 %v1006_v10, %v466_v61  ;;  %v1138_v23 = vadd.f32 %v1137_v13, %v582_v8  ;;  %v589_v24 = vld [vmem:[%s2482_s12 + $0xb88] sm:$0xff]  ;;  %v699_v28 = vld [vmem:[%s2482_s12 + $0xef8] sm:$0xff]  ;;  %v706_v30 = vld [vmem:[%s2482_s12 + $0xf30] sm:$0xff]  ;;  %v1420_v58 = vadd.s32 4294967240, %v2935_v53  ;;  %v3001_v10 = vsub.s32 %v1406_v41, %v2943_v1 }
  0xf6   : > { %1000 = vadd.xlane.f32.xlu0 %v999_v14  ;;  %v1267_v29 = vadd.f32 %v1266_v16, %v697_v11  ;;  %v1275_v31 = vadd.f32 %v1274_v17, %v704_v12  ;;  %v584_v32 = vld [vmem:[%s2482_s12 + $0xb60] sm:$0xff]  ;;  %v1146_v33 = vadd.f32 %v589_v24, %v588_v19  ;;  %v591_v38 = vld [vmem:[%s2482_s12 + $0xb98] sm:$0xff]  ;;  %v469_v40 = vld [vmem:[%s2482_s12 + $0x7c8] sm:$0xff]  ;;  %v3007_v17 = vsub.s32 %v1399_v42, %v2943_v1 }
  0xf7   : > { %v1008_v36 = vadd.f32 %v1007_v21, %v467_v9  ;;  %v1139_v37 = vadd.f32 %v1138_v23, %v583_v18  ;;  %v468_v39 = vld [vmem:[%s2482_s12 + $0x7c0] sm:$0xff]  ;;  %v707_v44 = vld [vmem:[%s2482_s12 + $0xf38] sm:$0xff]  ;;  %v585_v46 = vld [vmem:[%s2482_s12 + $0xb68] sm:$0xff]  ;;  %v2998_v9 = vsub.s32 %v1378_v35, %v2943_v1  ;;  %v3013_v23 = vsub.s32 %v1420_v58, %v2943_v1 }
  0xf8   : > { %v2966_v34 = vpop.xlane.xlu1 %757  ;;  %v1268_v43 = vadd.f32 %v1267_v29, %v698_v15  ;;  %v1276_v45 = vadd.f32 %v1275_v31, %v705_v22  ;;  %v1147_v47 = vadd.f32 %v1146_v33, %v590_v25  ;;  %v470_v48 = vld [vmem:[%s2482_s12 + $0x7d0] sm:$0xff]  ;;  %v1011_v49 = vadd.f32 %v469_v40, %v468_v39  ;;  %v592_v52 = vld [vmem:[%s2482_s12 + $0xba0] sm:$0xff]  ;;  %v471_v54 = vld [vmem:[%s2482_s12 + $0x7d8] sm:$0xff] }
  0xf9   : > { %1009 = vadd.xlane.f32.xlu1 %v1008_v36  ;;  %v586_v50 = vld [vmem:[%s2482_s12 + $0xb70] sm:$0xff]  ;;  %v1140_v51 = vadd.f32 %v1139_v37, %v584_v32  ;;  %v2983_v56 = vpop.xlane.xlu0 %739  ;;  %v596_v63 = vld [vmem:[%s2482_s12 + $0xbc0] sm:$0xff]  ;;  %v597_v0 = vld [vmem:[%s2482_s12 + $0xbc8] sm:$0xff]  ;;  %v1413_v58 = vadd.s32 4294967248, %v2935_v53 }
  0xfa   : > { %v1269_v59 = vadd.f32 %v1268_v43, %v699_v28  ;;  %v1277_v60 = vadd.f32 %v1276_v45, %v706_v30  ;;  %v1148_v61 = vadd.f32 %v1147_v47, %v591_v38  ;;  %v1012_v62 = vadd.f32 %v1011_v49, %v470_v48  ;;  %v598_v2 = vld [vmem:[%s2482_s12 + $0xbd0] sm:$0xff]  ;;  %v587_v3 = vld [vmem:[%s2482_s12 + $0xb78] sm:$0xff]  ;;  %v593_v5 = vld [vmem:[%s2482_s12 + $0xba8] sm:$0xff] }
  0xfb   : > { %v1141_v4 = vadd.f32 %v1140_v51, %v585_v46  ;;  %v472_v6 = vld [vmem:[%s2482_s12 + $0x7e0] sm:$0xff]  ;;  %v1155_v7 = vadd.f32 %v597_v0, %v596_v63  ;;  %v594_v12 = vld [vmem:[%s2482_s12 + $0xbb0] sm:$0xff]  ;;  %v599_v15 = vld [vmem:[%s2482_s12 + $0xbd8] sm:$0xff]  ;;  %v1377_v31 = vrot.slane %v2983_v56, %v2960_v26 }
  0xfc   : > { %v2995_v8 = vpop.xlane.xlu1 %766  ;;  %1270 = vadd.xlane.f32.xlu0 %v1269_v59  ;;  %v1278_v11 = vadd.f32 %v1277_v60, %v707_v44  ;;  %v1149_v13 = vadd.f32 %v1148_v61, %v592_v52  ;;  %v1013_v14 = vadd.f32 %v1012_v62, %v471_v54  ;;  %v708_v16 = vld [vmem:[%s2482_s12 + $0xf40] sm:$0xff]  ;;  %v473_v19 = vld [vmem:[%s2482_s12 + $0x7e8] sm:$0xff]  ;;  %v710_v22 = vld [vmem:[%s2482_s12 + $0xf50] sm:$0xff]  ;;  %v1389_v52 = vrot.slane %v2966_v34, %v2981_v55 }
  0xfd   : > { %v1142_v18 = vadd.f32 %v1141_v4, %v586_v50  ;;  %v1156_v20 = vadd.f32 %v1155_v7, %v598_v2  ;;  %v709_v21 = vld [vmem:[%s2482_s12 + $0xf48] sm:$0xff]  ;;  %v595_v24 = vld [vmem:[%s2482_s12 + $0xbb8] sm:$0xff]  ;;  %v474_v27 = vld [vmem:[%s2482_s12 + $0x7f0] sm:$0xff]  ;;  %v1396_v39 = vrot.slane %v2995_v8, %v2986_v57 }
  0xfe   : > { %1279 = vadd.xlane.f32.xlu1 %v1278_v11  ;;  %v1150_v25 = vadd.f32 %v1149_v13, %v593_v5  ;;  %v1014_v28 = vadd.f32 %v1013_v14, %v472_v6  ;;  %v600_v29 = vld [vmem:[%s2482_s12 + $0xbe0] sm:$0xff]  ;;  %v1281_v30 = vadd.f32 %v709_v21, %v708_v16  ;;  %v749_v32 = vpop.xlane.xlu0 %748  ;;  %v711_v36 = vld [vmem:[%s2482_s12 + $0xf58] sm:$0xff]  ;;  %v717_v38 = vld [vmem:[%s2482_s12 + $0xf88] sm:$0xff] }
  0xff   : > { %v1143_v33 = vadd.f32 %v1142_v18, %v587_v3  ;;  %v1157_v35 = vadd.f32 %v1156_v20, %v599_v15  ;;  %v716_v37 = vld [vmem:[%s2482_s12 + $0xf80] sm:$0xff]  ;;  %v1382_v40 = vrot.slane %v749_v32, %v2998_v9  ;;  %v475_v42 = vld [vmem:[%s2482_s12 + $0x7f8] sm:$0xff]  ;;  %v601_v44 = vld [vmem:[%s2482_s12 + $0xbe8] sm:$0xff] }
 0x100   : > { %v1151_v41 = vadd.f32 %v1150_v25, %v594_v12  ;;  %v1015_v43 = vadd.f32 %v1014_v28, %v473_v19  ;;  %v1282_v45 = vadd.f32 %v1281_v30, %v710_v22  ;;  %v718_v46 = vld [vmem:[%s2482_s12 + $0xf90] sm:$0xff]  ;;  %v1290_v47 = vadd.f32 %v717_v38, %v716_v37  ;;  %v712_v50 = vld [vmem:[%s2482_s12 + $0xf60] sm:$0xff]  ;;  %v719_v51 = vld [vmem:[%s2482_s12 + $0xf98] sm:$0xff] }
 0x101   : > { %1144 = vadd.xlane.f32.xlu0 %v1143_v33  ;;  %v602_v48 = vld [vmem:[%s2482_s12 + $0xbf0] sm:$0xff]  ;;  %v1158_v49 = vadd.f32 %v1157_v35, %v600_v29  ;;  %v1384_v54 = vsel %vm1383_vm0, %v1382_v40, %v1377_v31  ;;  %v785_v56 = vpop.xlane.xlu1 %784  ;;  %v724_v63 = vld [vmem:[%s2482_s12 + $0xfc0] sm:$0xff]  ;;  %v725_v0 = vld [vmem:[%s2482_s12 + $0xfc8] sm:$0xff]  ;;  %v3052_v30 = vsub.s32 %v1413_v58, %v2943_v1  ;;  %v1427_v37 = vadd.s32 4294967232, %v2935_v53 }
 0x102   : > { %v1152_v59 = vadd.f32 %v1151_v41, %v595_v24  ;;  %v1016_v60 = vadd.f32 %v1015_v43, %v474_v27  ;;  %v1283_v61 = vadd.f32 %v1282_v45, %v711_v36  ;;  %v1291_v62 = vadd.f32 %v1290_v47, %v718_v46  ;;  %v726_v2 = vld [vmem:[%s2482_s12 + $0xfd0] sm:$0xff]  ;;  %v713_v4 = vld [vmem:[%s2482_s12 + $0xf68] sm:$0xff]  ;;  %v720_v5 = vld [vmem:[%s2482_s12 + $0xfa0] sm:$0xff] }
 0x103   : > { %v1159_v3 = vadd.f32 %v1158_v49, %v601_v44  ;;  %v1299_v34 = vadd.f32 %v725_v0, %v724_v63  ;;  %v1391_v6 = vsel %vm1390_vm1, %v1389_v52, %v1384_v54  ;;  %v1410_v7 = vrot.slane %v785_v56, %v3001_v10  ;;  %v776_v8 = vpop.xlane.xlu0 %775  ;;  %v603_v12 = vld [vmem:[%s2482_s12 + $0xbf8] sm:$0xff]  ;;  %v714_v19 = vld [vmem:[%s2482_s12 + $0xf70] sm:$0xff]  ;;  %v721_v20 = vld [vmem:[%s2482_s12 + $0xfa8] sm:$0xff] }
 0x104   : > { %1153 = vadd.xlane.f32.xlu1 %v1152_v59  ;;  %v1017_v11 = vadd.f32 %v1016_v60, %v475_v42  ;;  %v1284_v13 = vadd.f32 %v1283_v61, %v712_v50  ;;  %v1292_v14 = vadd.f32 %v1291_v62, %v719_v51  ;;  %v727_v15 = vld [vmem:[%s2482_s12 + $0xfd8] sm:$0xff]  ;;  %v1398_v16 = vsel %vm1397_vm2, %v1396_v39, %v1391_v6  ;;  %v728_v28 = vld [vmem:[%s2482_s12 + $0xfe0] sm:$0xff]  ;;  %v722_v33 = vld [vmem:[%s2482_s12 + $0xfb0] sm:$0xff] }
 0x105   : > { %v1160_v18 = vadd.f32 %v1159_v3, %v602_v48  ;;  %v1300_v21 = vadd.f32 %v1299_v34, %v726_v2  ;;  %v1403_v22 = vrot.slane %v776_v8, %v3007_v17  ;;  %v1434_v24 = vadd.s32 4294967224, %v2935_v53  ;;  %v715_v32 = vld [vmem:[%s2482_s12 + $0xf78] sm:$0xff]  ;;  %v729_v40 = vld [vmem:[%s2482_s12 + $0xfe8] sm:$0xff]  ;;  %v730_v49 = vld [vmem:[%s2482_s12 + $0xff0] sm:$0xff] }
 0x106   : > { %1018 = vadd.xlane.f32.xlu0 %v1017_v11  ;;  %v1285_v25 = vadd.f32 %v1284_v13, %v713_v4  ;;  %v1293_v27 = vadd.f32 %v1292_v14, %v720_v5  ;;  %v803_v29 = vpop.xlane.xlu1 %802  ;;  %v723_v42 = vld [vmem:[%s2482_s12 + $0xfb8] sm:$0xff]  ;;  %v3068_v54 = vsub.s32 %v1427_v37, %v2943_v1  ;;  %v1448_v56 = vadd.s32 4294967208, %v2935_v53 }
 0x107   : > { %v1161_v31 = vadd.f32 %v1160_v18, %v603_v12  ;;  %v1301_v35 = vadd.f32 %v1300_v21, %v727_v15  ;;  %v1405_v36 = vsel %vm1404_vm3, %v1403_v22, %v1398_v16  ;;  %v1424_v44 = vrot.slane %v803_v29, %v3013_v23  ;;  %v731_v59 = vld [vmem:[%s2482_s12 + $0xff8] sm:$0xff] }
 0x108   : > { %v1286_v38 = vadd.f32 %v1285_v25, %v714_v19  ;;  %v1294_v39 = vadd.f32 %v1293_v27, %v721_v20  ;;  %v1412_v41 = vsel %vm1411_vm4, %v1410_v7, %v1405_v36  ;;  %v3063_v46 = vsub.s32 %v1434_v24, %v2943_v1 }
 0x109   : > { %1162 = vadd.xlane.f32.xlu1 %v1161_v31  ;;  %v1302_v43 = vadd.f32 %v1301_v35, %v728_v28  ;;  %v794_v45 = vpop.xlane.xlu0 %793  ;;  %v1441_v61 = vadd.s32 4294967216, %v2935_v53  ;;  %v3078_v5 = vsub.s32 %v1448_v56, %v2943_v1  ;;  %v1462_v8 = vadd.s32 4294967192, %v2935_v53 }
 0x10a   : > { %v1287_v47 = vadd.f32 %v1286_v38, %v715_v32  ;;  %v1295_v48 = vadd.f32 %v1294_v39, %v722_v33  ;;  %v1417_v50 = vrot.slane %v794_v45, %v3052_v30  ;;  %v1455_v12 = vadd.s32 4294967200, %v2935_v53 }
 0x10b   : > { %v1303_v51 = vadd.f32 %v1302_v43, %v729_v40  ;;  %v821_v52 = vpop.xlane.xlu1 %820  ;;  %v3081_v34 = vsub.s32 %v1441_v61, %v2943_v1  ;;  %v3090_v16 = vsub.s32 %v1462_v8, %v2943_v1  ;;  %v1476_v21 = vadd.s32 4294967176, %v2935_v53 }
 0x10c   : > { %1288 = vadd.xlane.f32.xlu0 %v1287_v47  ;;  %v1296_v58 = vadd.f32 %v1295_v48, %v723_v42  ;;  %v1419_v60 = vsel %vm1418_vm5, %v1417_v50, %v1412_v41  ;;  %v1438_v0 = vrot.slane %v821_v52, %v3063_v46  ;;  %v3094_v20 = vsub.s32 %v1455_v12, %v2943_v1 }
 0x10d   : > { %v1304_v62 = vadd.f32 %v1303_v51, %v730_v49  ;;  %v1426_v63 = vsel %vm1425_vm6, %v1424_v44, %v1419_v60  ;;  %v1469_v24 = vadd.s32 4294967184, %v2935_v53  ;;  %v3102_v29 = vsub.s32 %v1476_v21, %v2943_v1 }
 0x10e   : > { %v812_v2 = vpop.xlane.xlu0 %811 }
 0x10f   : > { %v1305_v3 = vadd.f32 %v1304_v62, %v731_v59  ;;  %v1431_v4 = vrot.slane %v812_v2, %v3068_v54  ;;  %v3105_v32 = vsub.s32 %v1469_v24, %v2943_v1 }
 0x110   : > { %1297 = vadd.xlane.f32.xlu0 %v1296_v58 }
 0x111   : > { %1306 = vadd.xlane.f32.xlu1 %v1305_v3  ;;  %v1433_v6 = vsel %vm1432_vm7, %v1431_v4, %v1426_v63  ;;  %v839_v7 = vpop.xlane.xlu1 %838 }
 0x112   : > { %v1440_v11 = vsel %vm1439_vm8, %v1438_v0, %v1433_v6  ;;  %v1452_v13 = vrot.slane %v839_v7, %v3078_v5 }
 0x113   : > { %v830_v14 = vpop.xlane.xlu0 %829 }
 0x114   : > { %v1445_v15 = vrot.slane %v830_v14, %v3081_v34 }
 0x116   : > { %v1447_v18 = vsel %vm1446_vm9, %v1445_v15, %v1440_v11  ;;  %v857_v19 = vpop.xlane.xlu1 %856 }
 0x117   : > { %v1454_v22 = vsel %vm1453_vm10, %v1452_v13, %v1447_v18  ;;  %v1466_v25 = vrot.slane %v857_v19, %v3090_v16 }
 0x119   : > { %v848_v27 = vpop.xlane.xlu0 %847 }
 0x11a   : > { %v1459_v28 = vrot.slane %v848_v27, %v3094_v20 }
 0x11b   : > { %v875_v31 = vpop.xlane.xlu1 %874 }
 0x11c   : > { %v1461_v33 = vsel %vm1460_vm11, %v1459_v28, %v1454_v22  ;;  %v1480_v53 = vrot.slane %v875_v31, %v3102_v29 }
 0x11d   : > { %v1468_v35 = vsel %vm1467_vm12, %v1466_v25, %v1461_v33 }
 0x11e   : > { %v866_v36 = vpop.xlane.xlu0 %865 }
 0x11f   : > { %v1473_v37 = vrot.slane %v866_v36, %v3105_v32 }
 0x121   : > { %v1475_v38 = vsel %vm1474_vm13, %v1473_v37, %v1468_v35  ;;  %v893_v39 = vpop.xlane.xlu1 %892 }
 0x122   : > { %v3113_v40 = vsel %vm1481_vm14, %v1480_v53, %v1475_v38  ;;  %v1490_v1 = vrot.slane %v893_v39, %v2998_v9 }
 0x123   : > { %v884_v41 = vpop.xlane.xlu0 %883 }
 0x124   : > { %v1486_v42 = vrot.slane %v884_v41, %v2960_v26 }
 0x126   : > { %v1491_v43 = vsel %vm1383_vm0, %v1490_v1, %v1486_v42  ;;  %v1028_v44 = vpop.xlane.xlu1 %1027 }
 0x127   : > { %v1565_v56 = vrot.slane %v1028_v44, %v2960_v26 }
 0x129   : > { %v902_v45 = vpop.xlane.xlu0 %901 }
 0x12a   : > { %v1495_v47 = vrot.slane %v902_v45, %v2981_v55 }
 0x12b   : > { %v911_v48 = vpop.xlane.xlu1 %910 }
 0x12c   : > { %v1496_v49 = vsel %vm1390_vm1, %v1495_v47, %v1491_v43  ;;  %v1500_v50 = vrot.slane %v911_v48, %v2986_v57 }
 0x12e   : > { %v1501_v51 = vsel %vm1397_vm2, %v1500_v50, %v1496_v49  ;;  %v1037_v52 = vpop.xlane.xlu0 %1036 }
 0x12f   : > { %v1569_v58 = vrot.slane %v1037_v52, %v2998_v9 }
 0x131   : > { %v1570_v59 = vsel %vm1383_vm0, %v1569_v58, %v1565_v56  ;;  %v1172_v60 = vpop.xlane.xlu1 %1171 }
 0x132   : > { %v1644_v48 = vrot.slane %v1172_v60, %v2960_v26 }
 0x133   : > { %v1046_v61 = vpop.xlane.xlu0 %1045 }
 0x134   : > { %v1574_v62 = vrot.slane %v1046_v61, %v2981_v55 }
 0x136   : > { %v1575_v63 = vsel %vm1390_vm1, %v1574_v62, %v1570_v59  ;;  %v920_v0 = vpop.xlane.xlu1 %919 }
 0x137   : > { %v1505_v42 = vrot.slane %v920_v0, %v3007_v17 }
 0x139   : > { %v1181_v2 = vpop.xlane.xlu0 %1180 }
 0x13a   : > { %v1648_v43 = vrot.slane %v1181_v2, %v2998_v9  ;;  %v1506_v9 = vsel %vm1404_vm3, %v1505_v42, %v1501_v51 }
 0x13b   : > { %v1190_v3 = vpop.xlane.xlu1 %1189 }
 0x13c   : > { %v1653_v45 = vrot.slane %v1190_v3, %v2981_v55  ;;  %v1649_v59 = vsel %vm1383_vm0, %v1648_v43, %v1644_v48  ;;  %vm1722_vm0 = vcmask 1042434  }
 0x13e   : > { %v1055_v4 = vpop.xlane.xlu0 %1054  ;;  %v1654_v61 = vsel %vm1390_vm1, %v1653_v45, %v1649_v59  ;;  %vm1724_vm1 = vcmask 1043459  }
 0x13f   : > { %v1579_v47 = vrot.slane %v1055_v4, %v2986_v57 }
 0x141   : > { %v1064_v6 = vpop.xlane.xlu1 %1063  ;;  %v1580_v26 = vsel %vm1397_vm2, %v1579_v47, %v1575_v63 }
 0x142   : > { %v1584_v49 = vrot.slane %v1064_v6, %v3007_v17 }
 0x143   : > { %v929_v7 = vpop.xlane.xlu0 %928 }
 0x144   : > { %v1510_v50 = vrot.slane %v929_v7, %v3001_v10 }
 0x146   : > { %v938_v8 = vpop.xlane.xlu1 %937  ;;  %v1511_v2 = vsel %vm1411_vm4, %v1510_v50, %v1506_v9 }
 0x147   : > { %v1515_v52 = vrot.slane %v938_v8, %v3052_v30 }
 0x149   : > { %v1199_v11 = vpop.xlane.xlu0 %1198  ;;  %v1516_v4 = vsel %vm1418_vm5, %v1515_v52, %v1511_v2 }
 0x14a   : > { %v1658_v56 = vrot.slane %v1199_v11, %v2986_v57  ;;  %v1585_v57 = vsel %vm1404_vm3, %v1584_v49, %v1580_v26 }
 0x14b   : > { %v3127_v12 = vpop.xlane.xlu1 %1207 }
 0x14c   : > { %v1659_v6 = vsel %vm1397_vm2, %v1658_v56, %v1654_v61  ;;  %v1663_v8 = vrot.slane %v3127_v12, %v3007_v17  ;;  %vm2324_vm2 = vmmov (!%p1998_p4), 0  }
 0x14e   : > { %v1073_v13 = vpop.xlane.xlu0 %1072 }
 0x14f   : > { %v1589_v60 = vrot.slane %v1073_v13, %v3001_v10 }
 0x151   : > { %v1082_v14 = vpop.xlane.xlu1 %1081 }
 0x152   : > { %v1594_v51 = vrot.slane %v1082_v14, %v3052_v30 }
 0x153   : > { %v947_v15 = vpop.xlane.xlu0 %946 }
 0x154   : > { %v1520_v55 = vrot.slane %v947_v15, %v3013_v23 }
 0x156   : > { %v956_v18 = vpop.xlane.xlu1 %955  ;;  %v1521_v11 = vsel %vm1425_vm6, %v1520_v55, %v1516_v4 }
 0x157   : > { %v1525_v62 = vrot.slane %v956_v18, %v3068_v54  ;;  %v1590_v18 = vsel %vm1411_vm4, %v1589_v60, %v1585_v57 }
 0x158   : > { %v1595_v17 = vsel %vm1418_vm5, %v1594_v51, %v1590_v18 }
 0x159   : > { %v3129_v19 = vpop.xlane.xlu0 %1216 }
 0x15a   : > { %v1668_v47 = vrot.slane %v3129_v19, %v3001_v10 }
 0x15b   : > { %v3131_v21 = vpop.xlane.xlu1 %1225 }
 0x15c   : > { %v1673_v49 = vrot.slane %v3131_v21, %v3052_v30 }
 0x15e   : > { %v1091_v22 = vpop.xlane.xlu0 %1090 }
 0x15f   : > { %v1599_v63 = vrot.slane %v1091_v22, %v3013_v23 }
 0x161   : > { %v3133_v24 = vpop.xlane.xlu1 %1099  ;;  %v1600_v42 = vsel %vm1425_vm6, %v1599_v63, %v1595_v17 }
 0x162   : > { %v1604_v13 = vrot.slane %v3133_v24, %v3068_v54 }
 0x163   : > { %v965_v25 = vpop.xlane.xlu0 %964 }
 0x164   : > { %v1530_v3 = vrot.slane %v965_v25, %v3063_v46  ;;  %v1526_v25 = vsel %vm1432_vm7, %v1525_v62, %v1521_v11  ;;  %v1605_v48 = vsel %vm1432_vm7, %v1604_v13, %v1600_v42  ;;  %v1739_v42 = vld [vmem:[%s3352_s1 + $0x20] sm:$0xff] (!%p1998_p4) }
 0x166   : > { %v974_v27 = vpop.xlane.xlu1 %973  ;;  %v1531_v12 = vsel %vm1439_vm8, %v1530_v3, %v1526_v25 }
 0x167   : > { %v1535_v7 = vrot.slane %v974_v27, %v3081_v34 }
 0x169   : > { %v3135_v28 = vpop.xlane.xlu0 %1234  ;;  %v1536_v43 = vsel %vm1446_vm9, %v1535_v7, %v1531_v12  ;;  %v1738_v12 = vld [vmem:[%s3352_s1 + $0x18] sm:$0xff] (!%p1998_p4) }
 0x16a   : > { %v1678_v30 = vrot.slane %v3135_v28, %v3013_v23 }
 0x16b   : > { %v3137_v31 = vpop.xlane.xlu1 %1243 }
 0x16c   : > { %v1683_v61 = vrot.slane %v3137_v31, %v3068_v54 }
 0x16e   : > { %v3139_v33 = vpop.xlane.xlu0 %1108 }
 0x16f   : > { %v1609_v22 = vrot.slane %v3139_v33, %v3063_v46 }
 0x171   : > { %v3141_v35 = vpop.xlane.xlu1 %1117  ;;  %v1610_v50 = vsel %vm1439_vm8, %v1609_v22, %v1605_v48  ;;  %v1736_v22 = vld [vmem:[%s3352_s1 + $0x8] sm:$0xff] (!%p1998_p4)  ;;  %v1743_v48 = vld [vmem:[%s3352_s1 + $0x40] sm:$0xff] (!%p1998_p4) }
 0x172   : > { %v1614_v24 = vrot.slane %v3141_v35, %v3081_v34 }
 0x173   : > { %v983_v53 = vpop.xlane.xlu0 %982 }
 0x174   : > { %v1540_v14 = vrot.slane %v983_v53, %v3078_v5  ;;  %v1615_v56 = vsel %vm1446_vm9, %v1614_v24, %v1610_v50  ;;  %v2325_v24 = vmov (!%p1998_p4), 0.0   ;;  %v1746_v50 = vld [vmem:[%s3352_s1 + $0x58] sm:$0xff] (!%p1998_p4) }
 0x175   : > { %2057 = vmatprep.mubr.msk.f32.mxu0 (!%p1998_p4), %vm2324_vm2, %v2325_v24  ;;  %2060 = vmatprep.subr.mxu1 (!%p1998_p4), %v2325_v24 }
 0x176   : > { %v992_v36 = vpop.xlane.xlu1 %991  ;;  %v1541_v35 = vsel %vm1453_vm10, %v1540_v14, %v1536_v43  ;;  %2062 = vmatprep.mubr.msk.f32.mxu1 (!%p1998_p4), %vm2324_vm2, %v2325_v24  ;;  %v1740_v43 = vld [vmem:[%s3352_s1 + $0x28] sm:$0xff] (!%p1998_p4) }
 0x177   : > { %v1545_v27 = vrot.slane %v992_v36, %v3094_v20 }
 0x179   : > { %v3143_v37 = vpop.xlane.xlu0 %1252 }
 0x17a   : > { %v1688_v57 = vrot.slane %v3143_v37, %v3063_v46 }
 0x17b   : > { %v3145_v38 = vpop.xlane.xlu1 %1261 }
 0x17c   : > { %v1693_v54 = vrot.slane %v3145_v38, %v3081_v34 }
 0x17e   : > { %v3147_v39 = vpop.xlane.xlu0 %1126 }
 0x17f   : > { %v1619_v45 = vrot.slane %v3147_v39, %v3078_v5  ;;  %v1546_v39 = vsel %vm1460_vm11, %v1545_v27, %v1541_v35  ;;  %v2323_v27 = vmov (!%p1998_p4), 0.0|0.0   ;;  %v1744_v35 = vld [vmem:[%s3352_s1 + $0x48] sm:$0xff] (!%p1998_p4) }
 0x180   : > { %2065 = vmatprep.subr.bf16.mxu0 (!%p1998_p4), %v2323_v27 }
 0x181   : > { %v3149_v1 = vpop.xlane.xlu1 %1135  ;;  %v1620_v21 = vsel %vm1453_vm10, %v1619_v45, %v1615_v56  ;;  %v2072_v45 = vpack.c.bf16 (!%p1998_p4), %v1740_v43, %v1739_v42 }
 0x183   : > { %v1001_v41 = vpop.xlane.xlu0 %1000 }
 0x184   : > { %v1550_v53 = vrot.slane %v1001_v41, %v3090_v16  ;;  %v1624_v41 = vrot.slane %v3149_v1, %v3094_v20  ;;  %v1664_v1 = vsel %vm1404_vm3, %v1663_v8, %v1659_v6  ;;  %vm1823_vm3 = vcmask (!%p1998_p4), 64512  }
 0x185   : > { %v1669_v55 = vsel %vm1411_vm4, %v1668_v47, %v1664_v1 }
 0x186   : > { %v3153_v44 = vpop.xlane.xlu1 %1009  ;;  %v1551_v10 = vsel %vm1467_vm12, %v1550_v53, %v1546_v39  ;;  %v1625_v26 = vsel %vm1460_vm11, %v1624_v41, %v1620_v21  ;;  %v1674_v51 = vsel %vm1418_vm5, %v1673_v49, %v1669_v55  ;;  %v2078_v41 = vpack.c.bf16 (!%p1998_p4), %v1744_v35, %v1743_v48  ;;  %v1745_v49 = vld [vmem:[%s3352_s1 + $0x50] sm:$0xff] (!%p1998_p4)  ;;  %v1822_v21 = vld [vmem:[#allocation5] sm:$0xff] (!%p1998_p4) }
 0x187   : > { %v1555_v33 = vrot.slane %v3153_v44, %v3105_v32  ;;  %v1679_v3 = vsel %vm1425_vm6, %v1678_v30, %v1674_v51  ;;  %v2081_v39 = vpack.c.bf16 (!%p1998_p4), %v1746_v50, %v1745_v49  ;;  %2061 = vmatpush3.msra.mxu1 (!%p1998_p4), %v1822_v21 }
 0x188   : > { %v1684_v6 = vsel %vm1432_vm7, %v1683_v61, %v1679_v3 }
 0x189   : > { %v3162_v58 = vpop.xlane.xlu0 %1270  ;;  %v1556_v59 = vsel %vm1474_vm13, %v1555_v33, %v1551_v10  ;;  %v1689_v7 = vsel %vm1439_vm8, %v1688_v57, %v1684_v6  ;;  %v1741_v33 = vld [vmem:[%s3352_s1 + $0x30] sm:$0xff] (!%p1998_p4) }
 0x18a   : > { %v1698_v4 = vrot.slane %v3162_v58, %v3078_v5  ;;  %v1694_v38 = vsel %vm1446_vm9, %v1693_v54, %v1689_v7  ;;  %v1749_v10 = vld [vmem:[%s3352_s1 + $0x70] sm:$0xff] (!%p1998_p4) }
 0x18b   : > { %v3171_v0 = vpop.xlane.xlu1 %1279 }
 0x18c   : > { %v1699_v8 = vsel %vm1453_vm10, %v1698_v4, %v1694_v38 }
 0x18e   : > { %v1145_v15 = vpop.xlane.xlu0 %1144 }
 0x18f   : > { %v1629_v44 = vrot.slane %v1145_v15, %v3090_v16  ;;  %v219_v15 = vld [vmem:[#allocation7] sm:$0xf] }
 0x191   : > { %v1154_v36 = vpop.xlane.xlu1 %1153  ;;  %v1630_v2 = vsel %vm1467_vm12, %v1629_v44, %v1625_v26  ;;  %v1747_v44 = vld [vmem:[%s3352_s1 + $0x60] sm:$0xff] (!%p1998_p4) }
 0x192   : > { %v1634_v19 = vrot.slane %v1154_v36, %v3105_v32  ;;  %v1742_v36 = vld [vmem:[%s3352_s1 + $0x38] sm:$0xff] (!%p1998_p4) }
 0x193   : > { %v1019_v52 = vpop.xlane.xlu0 %1018  ;;  %v2075_v47 = vpack.c.bf16 (!%p1998_p4), %v1742_v36, %v1741_v33 }
 0x194   : > { %v1560_v9 = vrot.slane %v1019_v52, %v3102_v29  ;;  %v1635_v31 = vsel %vm1474_vm13, %v1634_v19, %v1630_v2  ;;  %v1748_v52 = vld [vmem:[%s3352_s1 + $0x68] sm:$0xff] (!%p1998_p4)  ;;  %v1750_v19 = vld [vmem:[%s3352_s1 + $0x78] sm:$0xff] (!%p1998_p4) }
 0x195   : > { %v2084_v56 = vpack.c.bf16 (!%p1998_p4), %v1748_v52, %v1747_v44 }
 0x196   : > { %v1561_v60 = vsel %vm1481_vm14, %v1560_v9, %v1556_v59  ;;  %v1163_v62 = vpop.xlane.xlu1 %1162  ;;  %v2087_v9 = vpack.c.bf16 (!%p1998_p4), %v1750_v19, %v1749_v10 }
 0x197   : > { %v1721_v23 = vsel %vm1720_vm15, %v1561_v60, %v3113_v40  ;;  %v1639_v28 = vrot.slane %v1163_v62, %v3102_v29  ;;  %v1703_v40 = vrot.slane %v3171_v0, %v3094_v20 }
 0x199   : > { %v1640_v46 = vsel %vm1481_vm14, %v1639_v28, %v1635_v31  ;;  %v1289_v37 = vpop.xlane.xlu0 %1288  ;;  %v1704_v5 = vsel %vm1460_vm11, %v1703_v40, %v1699_v8 }
 0x19a   : > { %v1723_v63 = vsel %vm1722_vm0, %v1640_v46, %v1721_v23  ;;  %v1708_v34 = vrot.slane %v1289_v37, %v3090_v16 }
 0x19c   : > { %v1709_v14 = vsel %vm1467_vm12, %v1708_v34, %v1704_v5 }
 0x19d   : > { %v1298_v11 = vpop.xlane.xlu0 %1297 }
 0x19e   : > { %v1713_v58 = vrot.slane %v1298_v11, %v3105_v32  ;;  %v1307_v13 = vpop.xlane.xlu1 %1306  ;;  %v1735_v32 = vld [vmem:[%s3352_s1] sm:$0xff] (!%p1998_p4) }
 0x19f   : > { %v1718_v20 = vrot.slane %v1307_v13, %v3102_v29  ;;  %1732 = sbr.rel (%p1998_p4) target bundleno = 901 (0x385), region = 48  ;;  %v1737_v29 = vld [vmem:[%s3352_s1 + $0x10] sm:$0xff] (!%p1998_p4)  ;;  %v2066_v17 = vpack.c.bf16 (!%p1998_p4), %v1736_v22, %v1735_v32 }
 0x1a0   : > { %v1714_v0 = vsel %vm1474_vm13, %v1713_v58, %v1709_v14  ;;  %v2069_v53 = vpack.c.bf16 (!%p1998_p4), %v1738_v12, %v1737_v29 }
 0x1a1   : > { %v1719_v16 = vsel %vm1481_vm14, %v1718_v20, %v1714_v0  ;;  %2067 = vmatpush3.bf16.msra.mxu0 (!%p1998_p4), %v2066_v17 }
 0x1a2   : > { %v1725_v18 = vsel %vm1724_vm1, %v1719_v16, %v1723_v63  ;;  %2068 = vmatprep.subr.bf16.mxu0 (!%p1998_p4), %v2323_v27 }
 0x1a3   : > { %v1727_v25 = vadd.f32 %v1725_v18, %v219_v15 }
 0x1a5   : > { %1728 = vst [vmem:[#allocation7] sm:$0xf] %v1727_v25  ;;  %2070 = vmatpush3.bf16.msra.mxu0 (!%p1998_p4), %v2069_v53 }
 0x1a6   : > { %2071 = vmatprep.subr.bf16.mxu0 %v2323_v27 }
 0x1a9   : > { %2073 = vmatpush3.bf16.msra.mxu0 %v2072_v45 }
 0x1aa   : > { %2074 = vmatprep.subr.bf16.mxu0 %v2323_v27 }
 0x1ac   : > { %v1733_v1 = vld [vmem:[#allocation7] sm:$0xf] }
 0x1ad   : > { %2076 = vmatpush3.bf16.msra.mxu0 %v2075_v47  ;;  %v1734_v30 = vmul.f32 0.00048828125, %v1733_v1 }
 0x1ae   : > { %2077 = vmatprep.subr.bf16.mxu0 %v2323_v27 }
 0x1b1   : > { %2079 = vmatpush3.bf16.msra.mxu0 %v2078_v41 }
 0x1b2   : > { %2080 = vmatprep.subr.bf16.mxu0 %v2323_v27 }
 0x1b5   : > { %2082 = vmatpush3.bf16.msra.mxu0 %v2081_v39 }
 0x1b6   : > { %2083 = vmatprep.subr.bf16.mxu0 %v2323_v27 }
 0x1b9   : > { %2085 = vmatpush3.bf16.msra.mxu0 %v2084_v56 }
 0x1ba   : > { %2086 = vmatprep.subr.bf16.mxu0 %v2323_v27 }
 0x1bd   : > { %2088 = vmatpush3.bf16.msra.mxu0 %v2087_v9 }
 0x1c0   : > { %2058 = vmatmul.mubr.f32.vlgmr.msra.gmra.mrb[0].mxu0 %v1734_v30 }
 0x293   : > { %v1817_v59 = vpop.f32.mrb[0].mxu0 }
 0x294   : > { %v1821_v55 = vmax.f32 %v1817_v59, 0.0  ;;  %v2059_v61 = vpop.f32.mrb[1].mxu0 }
 0x296   : > { %2063 = vmatmul.mubr.msk.f32.vlgmr.msra.gmra.mrb[0].mxu1 %vm1823_vm3, %v1821_v55 }
 0x369   : > { %v1893_v26 = vpop.f32.mrb[0].mxu1 }
 0x36a   : > { %v2000_v60 = vmul.f32 -1.442695, %v1893_v26  ;;  %v2064_v62 = vpop.f32.mrb[1].mxu1 }
 0x36c   : > { %2169 = vpow2.f32 %v2000_v60 }
 0x376   : > { %v2170_v57 = vpop.eup %2169 }
 0x377   : > { %v1900_v2 = vadd.f32 1.0, %v2170_v57 }
 0x379   : > { %2171 = vrcp.f32 %v1900_v2 }
 0x383   : > { %v2172_v23 = vpop.eup %2171 }
 0x384   : > { %1903 = vst [vmem:[#allocation7] sm:$0xf] %v2172_v23 }
 0x385 PF: > { %p3307_p7 = scmp.eq.s32.totalorder %s1987_s18, 1  ;;  %s2326_s30 = smov [#allocation7]  }
 0x386   : > { %s1913_s24 = sshll.u32 %s2326_s30, 4  ;;  %s1914_s24 = int_to_ptr.vmem [resolvable:$true] %s1913_s24 }
 0x387   : > { %s2231_s7 = scalar_lea.vmem %s1914_s24, 64  ;;  %p2238_p6 = scmp.lt.s32.totalorder %s1914_s24, %s1914_s24 }
 0x388   : > { %p2232_p9 = scmp.ne.s32.totalorder %s1914_s24, %s2231_s7  ;;  %p2239_p8 = scmp.lt.s32.totalorder %s2231_s7, %s2231_s7 }
 0x38a   : > { %p2233_p10 = pnand %p2232_p9, %p3307_p7  ;;  %p2240_p13 = por %p2239_p8, %p2238_p6 }
 0x38c   : > { %p2234_p3 = pneg %p2233_p10 }
 0x38e   : > { %p2241_p1 = pnand %p2240_p13, %p2234_p3 }
 0x390   : > { %2244 = shalt.err (!%p2241_p1)
}
 0x391   : > { %s2245_s18 = scalar_lea.hbm %s3354_s3, 64 }
 0x392   : > { %p2246_p2 = scmp.ne.s32.totalorder %s3354_s3, %s2245_s18  ;;  %p2251_p5 = scmp.lt.u32.totalorder %s2245_s18, %s3354_s3 }
 0x394   : > { %p2247_p12 = pnand %p2246_p2, %p3307_p7 }
 0x396   : > { %p2248_p0 = pneg %p2247_p12 }
 0x398   : > { %p2253_p11 = pnand %p2251_p5, %p2248_p0 }
 0x39a   : > { %2256 = shalt.err (!%p2253_p11)
}
 0x39b   : > { %2096 = dma.vmem_to_hbm [thread:$0]  (%p3307_p7), %s1914_s24, 64, %s3354_s3, [#allocation4]  }
 0x39c   : > { %2290 = dma.done.wait (%p3307_p7), [#allocation4], 64  }
 0x39d   : > { %2292 = vsyncadd (%p3307_p7), [#allocation4], 4294967232 }
 0x39e PF: > { %s18_s17 = sadd.s32 1, %s2315_s17   ;;  %s3370_s12 = smov %s2299_s13 }
 0x39f   : > { %p15_p4 = scmp.ge.s32.totalorder %s18_s17, 4   ;;  %s3371_s13 = smov %s2303_s14 }
 0x3a0   : > { %s3372_s14 = smov %s2447_s5  ;;  %s3373_s15 = smov %s2311_s16 }
 0x3a1   : > { %s3374_s16 = smov %s3376_s11  ;;  %17 = sbr.rel (!%p15_p4) target bundleno = 6 (0x6), region = 82 }
 0x3a8   :  { %1926 = vsyncpa [#allocation3], 1 }
 0x3a9   :  { %1928 = vsyncpa [#allocation3 + $0x1], 1 }
 0x3aa   :  { %1929 = vsyncpa [#allocation6], 1 }
 0x3ab   :  { %1930 = vsyncpa [#allocation4], 1 }
 0x3ac   :  { %1932 = vsyncpa [#allocation4 + $0x1], 1 }

</bundles_post_ra>
